<compile_context>
chip_gen: v5e
topology: v5e:2x2
jax: 0.10.0
libtpu: 0.0.40
codegen_flags: <defaults>
</compile_context>

<pallas_src>
import functools
import math

import jax
import jax.numpy as jnp
from jax import lax
from jax.experimental import pallas as pl
from jax.experimental.pallas import tpu as pltpu


def _layernorm(x, w, b, eps=1e-5):
    mu = jnp.mean(x, axis=-1, keepdims=True)
    var = jnp.mean((x - mu) ** 2, axis=-1, keepdims=True)
    return (x - mu) * lax.rsqrt(var + eps) * w + b


def block_kernel(
    x_ref,                   # (1, tq, C) f32   current query tile of this batch element
    ln1w_ref, ln1b_ref,      # (1, C) f32
    wq_ref, bq_ref,          # (H, C, hd) bf16 (pre-scaled by 1/sqrt(hd)), (H, 1, hd) f32 (pre-scaled)
    wk_ref, bk_ref,          # (H, C, hd) bf16, (H, 1, hd) f32
    wv_ref, bv_ref,          # (H, C, hd) bf16, (H, 1, hd) f32
    wo_ref, bo_ref,          # (H, hd, C) bf16, (1, C) f32
    ln2w_ref, ln2b_ref,      # (1, C) f32
    wfc_ref, bfc_ref,        # (C, F) bf16, (1, F) f32
    wp_ref, bp_ref,          # (F, C) bf16, (1, C) f32
    slope_ref,               # (H, 1, 1) f32   ALiBi slope per head
    out_ref,                 # (1, tq, C)
    k_scr, v_scr,            # (nq, H, tq, hd) bf16 scratch: per-batch K/V, filled tile by tile
    *, n_head, head_dim, q_block, approximate_gelu,
):
    H, hd, tq = n_head, head_dim, q_block
    f32, bf16 = jnp.float32, jnp.bfloat16
    qb = pl.program_id(1)

    # ---- LayerNorm + fused per-head Q/K/V projection for this tile only ----
    x = x_ref[0].astype(f32)                                       # (tq, C)
    C = x.shape[-1]
    xn = _layernorm(x, ln1w_ref[0], ln1b_ref[0])                   # (tq, C) f32
    xnb = jnp.broadcast_to(xn.astype(bf16)[None], (H, tq, C))      # (H, tq, C) bf16

    # Leading-head batched matmuls: full-C contraction, no relayouts.
    q3 = jnp.einsum('hqc,hcd->hqd', xnb, wq_ref[...],
                    preferred_element_type=f32) + bq_ref[...]      # already * 1/sqrt(hd)
    k3 = jnp.einsum('hqc,hcd->hqd', xnb, wk_ref[...],
                    preferred_element_type=f32) + bk_ref[...]
    v3 = jnp.einsum('hqc,hcd->hqd', xnb, wv_ref[...],
                    preferred_element_type=f32) + bv_ref[...]
    q3b = q3.astype(bf16)
    k3b = k3.astype(bf16)
    v3b = v3.astype(bf16)

    # Stash this tile's K/V for later (strictly lower) query tiles of this batch
    # element.  Grid order is (batch outer, query tile inner, sequential), so by
    # causality every tile j <= qb has already been written when tile qb runs.
    k_scr[qb] = k3b
    v_scr[qb] = v3b

    # ---- ALiBi + causal bias pieces (generated in-kernel, hoisted) ----------
    row = lax.broadcasted_iota(jnp.int32, (tq, tq), 0)
    col = lax.broadcasted_iota(jnp.int32, (tq, tq), 1)
    slopes = slope_ref[...]                                        # (H, 1, 1) f32
    bias0 = slopes * (col - row).astype(f32)[None]                 # (H, tq, tq) within-tile ALiBi
    keep = (col <= row)[None]                                      # (1, tq, tq)
    # Finite sentinel (-1e30): safe because the diagonal tile always has >= 1
    # unmasked key per row, so the softmax denominator never underflows.
    bias_diag = jnp.where(keep, bias0, jnp.float32(-1e30))

    # ---- diagonal KV tile first (initializes the online-softmax state) ------
    s = jnp.einsum('hqd,hkd->hqk', q3b, k3b,
                   preferred_element_type=f32) + bias_diag         # (H, tq, tq)
    m = jnp.max(s, axis=-1, keepdims=True)                         # (H, tq, 1)
    p = jnp.exp(s - m)
    l = jnp.sum(p, axis=-1, keepdims=True)
    acc = jnp.einsum('hqk,hkd->hqd', p.astype(bf16), v3b,
                     preferred_element_type=f32)                   # (H, tq, hd)

    # ---- strictly-causal KV tiles 0..qb-1 (online softmax, masked keys never
    #      multiplied / exponentiated / summed) ------------------------------
    def kv_step(j, carry):
        m, l, acc = carry
        kj = k_scr[j]                                              # (H, tq, hd) bf16
        vj = v_scr[j]
        # global ALiBi offset between this KV tile and the query tile
        off = ((j - qb) * tq).astype(f32)                          # scalar (< 0)
        s = jnp.einsum('hqd,hkd->hqk', q3b, kj,
                       preferred_element_type=f32) + (bias0 + slopes * off)
        m_new = jnp.maximum(m, jnp.max(s, axis=-1, keepdims=True))
        alpha = jnp.exp(m - m_new)
        p = jnp.exp(s - m_new)
        l_new = alpha * l + jnp.sum(p, axis=-1, keepdims=True)
        acc_new = alpha * acc + jnp.einsum('hqk,hkd->hqd', p.astype(bf16), vj,
                                           preferred_element_type=f32)
        return m_new, l_new, acc_new

    m, l, acc = lax.fori_loop(0, qb, kv_step, (m, l, acc))

    # Softmax normalization.  approx reciprocal (~1e-3 rel err on the EUP) is
    # well within the 5e-3 tolerance for a single block; use approx=False when
    # stacking many layers.
    o = acc * pl.reciprocal(l, approx=True)                        # (H, tq, hd) f32

    # ---- output projection: per-head (hd, C) slabs + sum over heads ---------
    yh = jnp.einsum('hqd,hdc->hqc', o.astype(bf16), wo_ref[...],
                    preferred_element_type=f32)                    # (H, tq, C)
    y = jnp.sum(yh, axis=0) + bo_ref[0]                            # (tq, C) f32
    xr = x + y                                                     # residual 1

    # ---- MLP branch ----------------------------------------------------------
    xn2 = _layernorm(xr, ln2w_ref[0], ln2b_ref[0])
    h1 = jnp.dot(xn2.astype(bf16), wfc_ref[...],
                 preferred_element_type=f32) + bfc_ref[0]
    # tanh GELU (EUP slot); approximate_gelu=False restores exact erf GELU.
    h1 = jax.nn.gelu(h1, approximate=approximate_gelu)
    m2 = jnp.dot(h1.astype(bf16), wp_ref[...],
                 preferred_element_type=f32) + bp_ref[0]

    out_ref[0] = (xr + m2).astype(out_ref.dtype)                   # residual 2


def prepare_params(params, n_head):
    """One-time (load-time) weight preprocessing.  Call ONCE, not per forward:
    bf16 casts, per-head weight layout, 1/sqrt(hd) folded into Wq/bq."""
    C = params["wq"].shape[0]
    H = n_head
    hd = C // H
    scale = 1.0 / math.sqrt(hd)
    bf16, f32 = jnp.bfloat16, jnp.float32

    def per_head_in(w):  # (C, H*hd) -> (H, C, hd)
        return jnp.transpose(w.reshape(C, H, hd), (1, 0, 2))

    wkv = params["wkv"]
    bkv = params["bkv"].astype(f32).reshape(-1)
    return dict(
        ln1_w=params["ln1_w"].astype(f32).reshape(1, C),
        ln1_b=params["ln1_b"].astype(f32).reshape(1, C),
        ln2_w=params["ln2_w"].astype(f32).reshape(1, C),
        ln2_b=params["ln2_b"].astype(f32).reshape(1, C),
        wq3=(per_head_in(params["wq"].astype(f32)) * scale).astype(bf16),
        bq3=(params["bq"].astype(f32).reshape(H, 1, hd) * scale),
        wk3=per_head_in(wkv[:, :C].astype(f32)).astype(bf16),
        bk3=bkv[:C].reshape(H, 1, hd),
        wv3=per_head_in(wkv[:, C:].astype(f32)).astype(bf16),
        bv3=bkv[C:].reshape(H, 1, hd),
        wo3=params["wo"].astype(bf16).reshape(H, hd, C),
        bo=params["bo"].astype(f32).reshape(1, C),
        wfc=params["wfc"].astype(bf16),
        bfc=params["bfc"].astype(f32).reshape(1, -1),
        wp=params["wp"].astype(bf16),
        bp=params["bp"].astype(f32).reshape(1, C),
        alibi_m=params["alibi_m"].astype(f32).reshape(H, 1, 1),
    )


def _pick_q_block(T):
    if T <= 128:
        return T
    try:
        kind = jax.devices()[0].device_kind.lower()
    except Exception:
        kind = ""
    if "v6" in kind and T % 256 == 0:
        return 256   # v6e: 128 MiB VMEM, bigger M per MXU push
    return 128       # v5e / v7x


def block_forward(x, prep, n_head, *, q_block=None, vmem_limit_bytes=None,
                  single_buffer_weights=False, approximate_gelu=True):
    B, T, C = x.shape
    H = n_head
    hd = C // H
    F = prep["wfc"].shape[1]

    if q_block is None:
        q_block = _pick_q_block(T)
    assert T % q_block == 0, "sequence length must be a multiple of the query tile"
    nq = T // q_block

    # Constant-index weights: single-buffer them on v7x to halve resident VMEM.
    pipeline_mode = pl.Buffered(1) if single_buffer_weights else None

    def const_spec(shape):
        nd = len(shape)
        return pl.BlockSpec(shape, lambda b, q: (0,) * nd,
                            pipeline_mode=pipeline_mode)

    in_specs = [
        pl.BlockSpec((1, q_block, C), lambda b, q: (b, q, 0)),   # x: one query tile
        const_spec((1, C)), const_spec((1, C)),                  # ln1 w, b
        const_spec((H, C, hd)), const_spec((H, 1, hd)),          # Wq, bq  (pre-scaled)
        const_spec((H, C, hd)), const_spec((H, 1, hd)),          # Wk, bk
        const_spec((H, C, hd)), const_spec((H, 1, hd)),          # Wv, bv
        const_spec((H, hd, C)), const_spec((1, C)),              # Wo, bo
        const_spec((1, C)), const_spec((1, C)),                  # ln2 w, b
        const_spec((C, F)), const_spec((1, F)),                  # Wfc, bfc
        const_spec((F, C)), const_spec((1, C)),                  # Wp, bp
        const_spec((H, 1, 1)),                                   # ALiBi slopes (VMEM)
    ]

    kernel = functools.partial(block_kernel, n_head=H, head_dim=hd,
                               q_block=q_block, approximate_gelu=approximate_gelu)
    return pl.pallas_call(
        kernel,
        out_shape=jax.ShapeDtypeStruct((B, T, C), x.dtype),
        grid=(B, nq),
        in_specs=in_specs,
        out_specs=pl.BlockSpec((1, q_block, C), lambda b, q: (b, q, 0)),
        scratch_shapes=[
            pltpu.VMEM((nq, H, q_block, hd), jnp.bfloat16),  # K tiles (per batch element)
            pltpu.VMEM((nq, H, q_block, hd), jnp.bfloat16),  # V tiles
        ],
        compiler_params=pltpu.CompilerParams(
            dimension_semantics=("parallel", "arbitrary"),
            # Re-derive per generation for large T/F: ~48 MiB on v7x (64 MiB
            # physical), ~96 MiB on v5e/v6e.  None = compiler default (plenty here).
            vmem_limit_bytes=vmem_limit_bytes,
        ),
    )(
        x,
        prep["ln1_w"], prep["ln1_b"],
        prep["wq3"], prep["bq3"],
        prep["wk3"], prep["bk3"],
        prep["wv3"], prep["bv3"],
        prep["wo3"], prep["bo"],
        prep["ln2_w"], prep["ln2_b"],
        prep["wfc"], prep["bfc"],
        prep["wp"], prep["bp"],
        prep["alibi_m"],
    )


def block_reference(x, params, n_head):
    """Pure-JAX f32 reference mirroring the PyTorch forward (dropout=0, no cache)."""
    B, T, C = x.shape
    hd = C // n_head

    def ln(v, w, b):
        mu = v.mean(-1, keepdims=True)
        var = ((v - mu) ** 2).mean(-1, keepdims=True)
        return (v - mu) * lax.rsqrt(var + 1e-5) * w[0] + b[0]

    xn = ln(x, params["ln1_w"], params["ln1_b"])
    q = xn @ params["wq"] + params["bq"][0]
    kv = xn @ params["wkv"] + params["bkv"][0]
    k, v = kv[..., :C], kv[..., C:]
    q = q.reshape(B, T, n_head, hd).transpose(0, 2, 1, 3)
    k = k.reshape(B, T, n_head, hd).transpose(0, 2, 1, 3)
    v = v.reshape(B, T, n_head, hd).transpose(0, 2, 1, 3)
    att = (q @ k.transpose(0, 1, 3, 2)) / math.sqrt(hd)
    att = att + params["alibi_m"][None, :, None, None] * params["alibi_offset"][None, None]
    att = jnp.where(params["c_mask"][None, None] == 0, -jnp.inf, att)
    att = jax.nn.softmax(att, axis=-1)
    y = (att @ v).transpose(0, 2, 1, 3).reshape(B, T, C)
    y = y @ params["wo"] + params["bo"][0]
    x = x + y
    xn2 = ln(x, params["ln2_w"], params["ln2_b"])
    h = jax.nn.gelu(xn2 @ params["wfc"] + params["bfc"][0], approximate=False)
    return x + h @ params["wp"] + params["bp"][0]


if __name__ == "__main__":
    # Small config: B=2, T=16, n_embd=32, n_head=4, n_fexp=4, bias=True, dropout=0.
    # q_block=8 -> 2 query tiles per batch element, so both the diagonal-tile
    # path and the online-softmax KV loop are exercised.
    B, T, C, H, FEXP = 2, 16, 32, 4, 4
    F = FEXP * C

    key = jax.random.PRNGKey(0)
    ks = jax.random.split(key, 16)
    s = 0.02

    params = {
        "ln1_w": 1.0 + 0.1 * jax.random.normal(ks[6], (1, C), jnp.float32),
        "ln1_b": 0.1 * jax.random.normal(ks[7], (1, C), jnp.float32),
        "wq":  s * jax.random.normal(ks[0], (C, C), jnp.float32),
        "bq":  s * jax.random.normal(ks[8], (1, C), jnp.float32),
        "wkv": s * jax.random.normal(ks[1], (C, 2 * C), jnp.float32),
        "bkv": s * jax.random.normal(ks[9], (1, 2 * C), jnp.float32),
        "wo":  s * jax.random.normal(ks[2], (C, C), jnp.float32),
        "bo":  s * jax.random.normal(ks[10], (1, C), jnp.float32),
        "ln2_w": 1.0 + 0.1 * jax.random.normal(ks[11], (1, C), jnp.float32),
        "ln2_b": 0.1 * jax.random.normal(ks[12], (1, C), jnp.float32),
        "wfc": s * jax.random.normal(ks[3], (C, F), jnp.float32),
        "bfc": s * jax.random.normal(ks[13], (1, F), jnp.float32),
        "wp":  s * jax.random.normal(ks[4], (F, C), jnp.float32),
        "bp":  s * jax.random.normal(ks[14], (1, C), jnp.float32),
    }

    # ALiBi: slope m_h = 2^{-8(h+1)/H}; offset[i,j] = -(i-j) for j <= i, else 0.
    slopes = jnp.array([2.0 ** (-8.0 * (h + 1) / H) for h in range(H)], jnp.float32)
    ii = jnp.arange(T)[:, None]
    jj = jnp.arange(T)[None, :]
    params["alibi_m"] = slopes                                                   # (H,)
    params["alibi_offset"] = jnp.where(jj <= ii, -(ii - jj), 0).astype(jnp.float32)  # ref only
    params["c_mask"] = (jj <= ii).astype(jnp.float32)                            # ref only

    x = jax.random.normal(ks[5], (B, T, C), jnp.float32)

    prep = prepare_params(params, n_head=H)           # one-time weight prep (bf16, per-head)
    out = block_forward(x, prep, n_head=H, q_block=8)
    out = jax.block_until_ready(out)

    ref = block_reference(x, params, n_head=H)
    assert out.shape == (B, T, C)
    # bf16 MXU operands (f32 accumulation) + tanh GELU + approx reciprocal ->
    # slightly looser tolerance vs the f32 exact-GELU reference.
    err = jnp.max(jnp.abs(out - ref))
    assert jnp.allclose(out, ref, atol=5e-3, rtol=5e-3), f"max abs diff {err}"

    print("KERNEL_OK")
</pallas_src>

<mosaic_0001>
module attributes {stable_mosaic.version = 11 : i64} {
  func.func @block_kernel(%arg0: i32, %arg1: i32, %arg2: memref<1x8x32xf32, #tpu.memory_space<vmem>>, %arg3: memref<1x32xf32, #tpu.memory_space<vmem>>, %arg4: memref<1x32xf32, #tpu.memory_space<vmem>>, %arg5: memref<4x32x8xbf16, #tpu.memory_space<vmem>>, %arg6: memref<4x1x8xf32, #tpu.memory_space<vmem>>, %arg7: memref<4x32x8xbf16, #tpu.memory_space<vmem>>, %arg8: memref<4x1x8xf32, #tpu.memory_space<vmem>>, %arg9: memref<4x32x8xbf16, #tpu.memory_space<vmem>>, %arg10: memref<4x1x8xf32, #tpu.memory_space<vmem>>, %arg11: memref<4x8x32xbf16, #tpu.memory_space<vmem>>, %arg12: memref<1x32xf32, #tpu.memory_space<vmem>>, %arg13: memref<1x32xf32, #tpu.memory_space<vmem>>, %arg14: memref<1x32xf32, #tpu.memory_space<vmem>>, %arg15: memref<32x128xbf16, #tpu.memory_space<vmem>>, %arg16: memref<1x128xf32, #tpu.memory_space<vmem>>, %arg17: memref<128x32xbf16, #tpu.memory_space<vmem>>, %arg18: memref<1x32xf32, #tpu.memory_space<vmem>>, %arg19: memref<4x1x1xf32, #tpu.memory_space<vmem>>, %arg20: memref<1x8x32xf32, #tpu.memory_space<vmem>>, %arg21: memref<2x4x8x8xbf16, #tpu.memory_space<vmem>>, %arg22: memref<2x4x8x8xbf16, #tpu.memory_space<vmem>>) attributes {dimension_semantics = [#tpu.dimension_semantics<parallel>, #tpu.dimension_semantics<arbitrary>], iteration_bounds = array<i64: 2, 2>, scalar_prefetch = 0 : i64, scratch_operands = 2 : i64, tpu.core_type = #tpu.core_type<tc>, window_params = [{transform_indices = @transform_0, window_bounds = array<i64: 1, 8, 32>}, {pipeline_mode = #tpu.pipeline_mode<synchronous>, transform_indices = @transform_1, window_bounds = array<i64: 1, 32>}, {pipeline_mode = #tpu.pipeline_mode<synchronous>, transform_indices = @transform_2, window_bounds = array<i64: 1, 32>}, {pipeline_mode = #tpu.pipeline_mode<synchronous>, transform_indices = @transform_3, window_bounds = array<i64: 4, 32, 8>}, {pipeline_mode = #tpu.pipeline_mode<synchronous>, transform_indices = @transform_4, window_bounds = array<i64: 4, 1, 8>}, {pipeline_mode = #tpu.pipeline_mode<synchronous>, transform_indices = @transform_5, window_bounds = array<i64: 4, 32, 8>}, {pipeline_mode = #tpu.pipeline_mode<synchronous>, transform_indices = @transform_6, window_bounds = array<i64: 4, 1, 8>}, {pipeline_mode = #tpu.pipeline_mode<synchronous>, transform_indices = @transform_7, window_bounds = array<i64: 4, 32, 8>}, {pipeline_mode = #tpu.pipeline_mode<synchronous>, transform_indices = @transform_8, window_bounds = array<i64: 4, 1, 8>}, {pipeline_mode = #tpu.pipeline_mode<synchronous>, transform_indices = @transform_9, window_bounds = array<i64: 4, 8, 32>}, {pipeline_mode = #tpu.pipeline_mode<synchronous>, transform_indices = @transform_10, window_bounds = array<i64: 1, 32>}, {pipeline_mode = #tpu.pipeline_mode<synchronous>, transform_indices = @transform_11, window_bounds = array<i64: 1, 32>}, {pipeline_mode = #tpu.pipeline_mode<synchronous>, transform_indices = @transform_12, window_bounds = array<i64: 1, 32>}, {pipeline_mode = #tpu.pipeline_mode<synchronous>, transform_indices = @transform_13, window_bounds = array<i64: 32, 128>}, {pipeline_mode = #tpu.pipeline_mode<synchronous>, transform_indices = @transform_14, window_bounds = array<i64: 1, 128>}, {pipeline_mode = #tpu.pipeline_mode<synchronous>, transform_indices = @transform_15, window_bounds = array<i64: 128, 32>}, {pipeline_mode = #tpu.pipeline_mode<synchronous>, transform_indices = @transform_16, window_bounds = array<i64: 1, 32>}, {pipeline_mode = #tpu.pipeline_mode<synchronous>, transform_indices = @transform_17, window_bounds = array<i64: 4, 1, 1>}, {transform_indices = @transform_18, window_bounds = array<i64: 1, 8, 32>}]} {
    %c0 = arith.constant 0 : index
    %c0_0 = arith.constant 0 : index
    %c0_1 = arith.constant 0 : index
    %0 = vector.load %arg2[%c0, %c0_0, %c0_1] : memref<1x8x32xf32, #tpu.memory_space<vmem>>, vector<1x8x32xf32>
    %1 = vector.shape_cast %0 : vector<1x8x32xf32> to vector<8x32xf32>
    %c0_2 = arith.constant 0 : index
    %c0_3 = arith.constant 0 : index
    %2 = vector.load %arg3[%c0_2, %c0_3] : memref<1x32xf32, #tpu.memory_space<vmem>>, vector<1x32xf32>
    %3 = vector.shape_cast %2 : vector<1x32xf32> to vector<32xf32>
    %c0_4 = arith.constant 0 : index
    %c0_5 = arith.constant 0 : index
    %4 = vector.load %arg4[%c0_4, %c0_5] : memref<1x32xf32, #tpu.memory_space<vmem>>, vector<1x32xf32>
    %5 = vector.shape_cast %4 : vector<1x32xf32> to vector<32xf32>
    %cst = arith.constant dense<0.000000e+00> : vector<8xf32>
    %6 = vector.multi_reduction <add>, %1, %cst [1] : vector<8x32xf32> to vector<8xf32>
    %7 = vector.shape_cast %6 : vector<8xf32> to vector<8x1xf32>
    %cst_6 = arith.constant 3.200000e+01 : f32
    %8 = vector.broadcast %cst_6 : f32 to vector<8x1xf32>
    %9 = arith.divf %7, %8 : vector<8x1xf32>
    %10 = vector.broadcast %9 : vector<8x1xf32> to vector<8x32xf32>
    %11 = arith.subf %1, %10 : vector<8x32xf32>
    %12 = arith.mulf %11, %11 : vector<8x32xf32>
    %cst_7 = arith.constant dense<0.000000e+00> : vector<8xf32>
    %13 = vector.multi_reduction <add>, %12, %cst_7 [1] : vector<8x32xf32> to vector<8xf32>
    %14 = vector.shape_cast %13 : vector<8xf32> to vector<8x1xf32>
    %cst_8 = arith.constant 3.200000e+01 : f32
    %15 = vector.broadcast %cst_8 : f32 to vector<8x1xf32>
    %16 = arith.divf %14, %15 : vector<8x1xf32>
    %17 = vector.broadcast %9 : vector<8x1xf32> to vector<8x32xf32>
    %18 = arith.subf %1, %17 : vector<8x32xf32>
    %cst_9 = arith.constant 9.99999974E-6 : f32
    %19 = vector.broadcast %cst_9 : f32 to vector<8x1xf32>
    %20 = arith.addf %16, %19 : vector<8x1xf32>
    %21 = math.rsqrt %20 : vector<8x1xf32>
    %22 = vector.broadcast %21 : vector<8x1xf32> to vector<8x32xf32>
    %23 = arith.mulf %18, %22 : vector<8x32xf32>
    %24 = vector.shape_cast %3 : vector<32xf32> to vector<1x32xf32>
    %25 = vector.broadcast %24 : vector<1x32xf32> to vector<8x32xf32>
    %26 = arith.mulf %23, %25 : vector<8x32xf32>
    %27 = vector.shape_cast %5 : vector<32xf32> to vector<1x32xf32>
    %28 = vector.broadcast %27 : vector<1x32xf32> to vector<8x32xf32>
    %29 = arith.addf %26, %28 : vector<8x32xf32>
    %30 = arith.truncf %29 : vector<8x32xf32> to vector<8x32xbf16>
    %31 = vector.shape_cast %30 : vector<8x32xbf16> to vector<1x8x32xbf16>
    %32 = vector.shape_cast %31 : vector<1x8x32xbf16> to vector<1x8x32xbf16>
    %33 = vector.broadcast %32 : vector<1x8x32xbf16> to vector<4x8x32xbf16>
    %c0_10 = arith.constant 0 : index
    %c0_11 = arith.constant 0 : index
    %c0_12 = arith.constant 0 : index
    %34 = vector.load %arg5[%c0_10, %c0_11, %c0_12] : memref<4x32x8xbf16, #tpu.memory_space<vmem>>, vector<4x32x8xbf16>
    "tpu.trace_start"() <{level = 10 : i32, message = "hqc,hcd->hqd"}> : () -> ()
    %cst_13 = arith.constant dense<0.000000e+00> : vector<4x8x8xf32>
    %35 = tpu.matmul %33, %34, %cst_13 {dimension_numbers = #tpu.dot_dimension_numbers<[2], [1], [1], [2], [0, 0, 0, 1, 1, 2], [0], [0]>} : vector<4x8x32xbf16>, vector<4x32x8xbf16>, vector<4x8x8xf32> -> vector<4x8x8xf32>
    "tpu.trace_stop"() : () -> ()
    %c0_14 = arith.constant 0 : index
    %c0_15 = arith.constant 0 : index
    %c0_16 = arith.constant 0 : index
    %36 = vector.load %arg6[%c0_14, %c0_15, %c0_16] : memref<4x1x8xf32, #tpu.memory_space<vmem>>, vector<4x1x8xf32>
    %37 = vector.broadcast %36 : vector<4x1x8xf32> to vector<4x8x8xf32>
    %38 = arith.addf %35, %37 : vector<4x8x8xf32>
    %c0_17 = arith.constant 0 : index
    %c0_18 = arith.constant 0 : index
    %c0_19 = arith.constant 0 : index
    %39 = vector.load %arg7[%c0_17, %c0_18, %c0_19] : memref<4x32x8xbf16, #tpu.memory_space<vmem>>, vector<4x32x8xbf16>
    "tpu.trace_start"() <{level = 10 : i32, message = "hqc,hcd->hqd"}> : () -> ()
    %cst_20 = arith.constant dense<0.000000e+00> : vector<4x8x8xf32>
    %40 = tpu.matmul %33, %39, %cst_20 {dimension_numbers = #tpu.dot_dimension_numbers<[2], [1], [1], [2], [0, 0, 0, 1, 1, 2], [0], [0]>} : vector<4x8x32xbf16>, vector<4x32x8xbf16>, vector<4x8x8xf32> -> vector<4x8x8xf32>
    "tpu.trace_stop"() : () -> ()
    %c0_21 = arith.constant 0 : index
    %c0_22 = arith.constant 0 : index
    %c0_23 = arith.constant 0 : index
    %41 = vector.load %arg8[%c0_21, %c0_22, %c0_23] : memref<4x1x8xf32, #tpu.memory_space<vmem>>, vector<4x1x8xf32>
    %42 = vector.broadcast %41 : vector<4x1x8xf32> to vector<4x8x8xf32>
    %43 = arith.addf %40, %42 : vector<4x8x8xf32>
    %c0_24 = arith.constant 0 : index
    %c0_25 = arith.constant 0 : index
    %c0_26 = arith.constant 0 : index
    %44 = vector.load %arg9[%c0_24, %c0_25, %c0_26] : memref<4x32x8xbf16, #tpu.memory_space<vmem>>, vector<4x32x8xbf16>
    "tpu.trace_start"() <{level = 10 : i32, message = "hqc,hcd->hqd"}> : () -> ()
    %cst_27 = arith.constant dense<0.000000e+00> : vector<4x8x8xf32>
    %45 = tpu.matmul %33, %44, %cst_27 {dimension_numbers = #tpu.dot_dimension_numbers<[2], [1], [1], [2], [0, 0, 0, 1, 1, 2], [0], [0]>} : vector<4x8x32xbf16>, vector<4x32x8xbf16>, vector<4x8x8xf32> -> vector<4x8x8xf32>
    "tpu.trace_stop"() : () -> ()
    %c0_28 = arith.constant 0 : index
    %c0_29 = arith.constant 0 : index
    %c0_30 = arith.constant 0 : index
    %46 = vector.load %arg10[%c0_28, %c0_29, %c0_30] : memref<4x1x8xf32, #tpu.memory_space<vmem>>, vector<4x1x8xf32>
    %47 = vector.broadcast %46 : vector<4x1x8xf32> to vector<4x8x8xf32>
    %48 = arith.addf %45, %47 : vector<4x8x8xf32>
    %49 = arith.truncf %38 : vector<4x8x8xf32> to vector<4x8x8xbf16>
    %50 = arith.truncf %43 : vector<4x8x8xf32> to vector<4x8x8xbf16>
    %51 = arith.truncf %48 : vector<4x8x8xf32> to vector<4x8x8xbf16>
    %52 = arith.index_cast %arg1 : i32 to index
    %c0_31 = arith.constant 0 : index
    %c0_32 = arith.constant 0 : index
    %c0_33 = arith.constant 0 : index
    %53 = vector.load %arg21[%52, %c0_31, %c0_32, %c0_33] : memref<2x4x8x8xbf16, #tpu.memory_space<vmem>>, vector<1x4x8x8xbf16>
    %54 = vector.shape_cast %53 : vector<1x4x8x8xbf16> to vector<4x8x8xbf16>
    %55 = vector.shape_cast %50 : vector<4x8x8xbf16> to vector<1x4x8x8xbf16>
    tpu.vector_store %arg21[%52, %c0_31, %c0_32, %c0_33], %55 {strides = array<i32>} : memref<2x4x8x8xbf16, #tpu.memory_space<vmem>>, vector<1x4x8x8xbf16>,
    %56 = arith.index_cast %arg1 : i32 to index
    %c0_34 = arith.constant 0 : index
    %c0_35 = arith.constant 0 : index
    %c0_36 = arith.constant 0 : index
    %57 = vector.load %arg22[%56, %c0_34, %c0_35, %c0_36] : memref<2x4x8x8xbf16, #tpu.memory_space<vmem>>, vector<1x4x8x8xbf16>
    %58 = vector.shape_cast %57 : vector<1x4x8x8xbf16> to vector<4x8x8xbf16>
    %59 = vector.shape_cast %51 : vector<4x8x8xbf16> to vector<1x4x8x8xbf16>
    tpu.vector_store %arg22[%56, %c0_34, %c0_35, %c0_36], %59 {strides = array<i32>} : memref<2x4x8x8xbf16, #tpu.memory_space<vmem>>, vector<1x4x8x8xbf16>,
    %60 = tpu.iota {dimensions = array<i32: 0>} : vector<8x8xi32>
    %61 = tpu.iota {dimensions = array<i32: 1>} : vector<8x8xi32>
    %c0_37 = arith.constant 0 : index
    %c0_38 = arith.constant 0 : index
    %c0_39 = arith.constant 0 : index
    %62 = vector.load %arg19[%c0_37, %c0_38, %c0_39] : memref<4x1x1xf32, #tpu.memory_space<vmem>>, vector<4x1x1xf32>
    %63 = arith.subi %61, %60 : vector<8x8xi32>
    %64 = arith.sitofp %63 : vector<8x8xi32> to vector<8x8xf32>
    %65 = vector.shape_cast %64 : vector<8x8xf32> to vector<1x8x8xf32>
    %66 = vector.broadcast %62 : vector<4x1x1xf32> to vector<4x8x8xf32>
    %67 = vector.broadcast %65 : vector<1x8x8xf32> to vector<4x8x8xf32>
    %68 = arith.mulf %66, %67 : vector<4x8x8xf32>
    %69 = arith.cmpi sle, %61, %60 : vector<8x8xi32>
    %70 = vector.shape_cast %69 : vector<8x8xi1> to vector<1x8x8xi1>
    %cst_40 = arith.constant -1.000000e+30 : f32
    %71 = vector.shape_cast %70 : vector<1x8x8xi1> to vector<1x8x8xi1>
    %72 = vector.broadcast %71 : vector<1x8x8xi1> to vector<4x8x8xi1>
    %73 = vector.broadcast %cst_40 : f32 to vector<4x8x8xf32>
    %74 = arith.select %72, %68, %73 : vector<4x8x8xi1>, vector<4x8x8xf32>
    "tpu.trace_start"() <{level = 10 : i32, message = "hqd,hkd->hqk"}> : () -> ()
    %cst_41 = arith.constant dense<0.000000e+00> : vector<4x8x8xf32>
    %75 = tpu.matmul %49, %50, %cst_41 {dimension_numbers = #tpu.dot_dimension_numbers<[2], [2], [1], [1], [0, 0, 0, 1, 1, 1], [0], [0]>} : vector<4x8x8xbf16>, vector<4x8x8xbf16>, vector<4x8x8xf32> -> vector<4x8x8xf32>
    "tpu.trace_stop"() : () -> ()
    %76 = arith.addf %75, %74 : vector<4x8x8xf32>
    %cst_42 = arith.constant dense<0xFF800000> : vector<4x8xf32>
    %77 = vector.multi_reduction <maximumf>, %76, %cst_42 [2] : vector<4x8x8xf32> to vector<4x8xf32>
    %78 = vector.shape_cast %77 : vector<4x8xf32> to vector<4x8x1xf32>
    %79 = vector.broadcast %78 : vector<4x8x1xf32> to vector<4x8x8xf32>
    %80 = arith.subf %76, %79 : vector<4x8x8xf32>
    %81 = math.exp %80 : vector<4x8x8xf32>
    %cst_43 = arith.constant dense<0.000000e+00> : vector<4x8xf32>
    %82 = vector.multi_reduction <add>, %81, %cst_43 [2] : vector<4x8x8xf32> to vector<4x8xf32>
    %83 = vector.shape_cast %82 : vector<4x8xf32> to vector<4x8x1xf32>
    %84 = arith.truncf %81 : vector<4x8x8xf32> to vector<4x8x8xbf16>
    "tpu.trace_start"() <{level = 10 : i32, message = "hqk,hkd->hqd"}> : () -> ()
    %cst_44 = arith.constant dense<0.000000e+00> : vector<4x8x8xf32>
    %85 = tpu.matmul %84, %51, %cst_44 {dimension_numbers = #tpu.dot_dimension_numbers<[2], [1], [1], [2], [0, 0, 0, 1, 1, 2], [0], [0]>} : vector<4x8x8xbf16>, vector<4x8x8xbf16>, vector<4x8x8xf32> -> vector<4x8x8xf32>
    %c0_i32 = arith.constant 0 : i32
    "tpu.trace_stop"() : () -> ()
    %86 = arith.subi %arg1, %c0_i32 : i32
    %87 = arith.addi %c0_i32, %86 : i32
    %c1_i32 = arith.constant 1 : i32
    %88:3 = scf.for %arg23 = %c0_i32 to %87 step %c1_i32 iter_args(%arg24 = %78, %arg25 = %83, %arg26 = %85) -> (vector<4x8x1xf32>, vector<4x8x1xf32>, vector<4x8x8xf32>)  : i32 {
      %163 = arith.index_cast %arg23 : i32 to index
      %c0_78 = arith.constant 0 : index
      %c0_79 = arith.constant 0 : index
      %c0_80 = arith.constant 0 : index
      %164 = vector.load %arg21[%163, %c0_78, %c0_79, %c0_80] : memref<2x4x8x8xbf16, #tpu.memory_space<vmem>>, vector<1x4x8x8xbf16>
      %165 = vector.shape_cast %164 : vector<1x4x8x8xbf16> to vector<4x8x8xbf16>
      %166 = arith.index_cast %arg23 : i32 to index
      %c0_81 = arith.constant 0 : index
      %c0_82 = arith.constant 0 : index
      %c0_83 = arith.constant 0 : index
      %167 = vector.load %arg22[%166, %c0_81, %c0_82, %c0_83] : memref<2x4x8x8xbf16, #tpu.memory_space<vmem>>, vector<1x4x8x8xbf16>
      %168 = vector.shape_cast %167 : vector<1x4x8x8xbf16> to vector<4x8x8xbf16>
      %169 = arith.subi %arg23, %arg1 : i32
      %c8_i32 = arith.constant 8 : i32
      %170 = arith.muli %169, %c8_i32 : i32
      %171 = arith.sitofp %170 : i32 to f32
      "tpu.trace_start"() <{level = 10 : i32, message = "hqd,hkd->hqk"}> : () -> ()
      %cst_84 = arith.constant dense<0.000000e+00> : vector<4x8x8xf32>
      %172 = tpu.matmul %49, %165, %cst_84 {dimension_numbers = #tpu.dot_dimension_numbers<[2], [2], [1], [1], [0, 0, 0, 1, 1, 1], [0], [0]>} : vector<4x8x8xbf16>, vector<4x8x8xbf16>, vector<4x8x8xf32> -> vector<4x8x8xf32>
      "tpu.trace_stop"() : () -> ()
      %173 = vector.broadcast %171 : f32 to vector<4x1x1xf32>
      %174 = arith.mulf %62, %173 : vector<4x1x1xf32>
      %175 = vector.broadcast %174 : vector<4x1x1xf32> to vector<4x8x8xf32>
      %176 = arith.addf %68, %175 : vector<4x8x8xf32>
      %177 = arith.addf %172, %176 : vector<4x8x8xf32>
      %cst_85 = arith.constant dense<0xFF800000> : vector<4x8xf32>
      %178 = vector.multi_reduction <maximumf>, %177, %cst_85 [2] : vector<4x8x8xf32> to vector<4x8xf32>
      %179 = vector.shape_cast %178 : vector<4x8xf32> to vector<4x8x1xf32>
      %180 = arith.maximumf %arg24, %179 : vector<4x8x1xf32>
      %181 = arith.subf %arg24, %180 : vector<4x8x1xf32>
      %182 = math.exp %181 : vector<4x8x1xf32>
      %183 = vector.broadcast %180 : vector<4x8x1xf32> to vector<4x8x8xf32>
      %184 = arith.subf %177, %183 : vector<4x8x8xf32>
      %185 = math.exp %184 : vector<4x8x8xf32>
      %186 = arith.mulf %182, %arg25 : vector<4x8x1xf32>
      %cst_86 = arith.constant dense<0.000000e+00> : vector<4x8xf32>
      %187 = vector.multi_reduction <add>, %185, %cst_86 [2] : vector<4x8x8xf32> to vector<4x8xf32>
      %188 = vector.shape_cast %187 : vector<4x8xf32> to vector<4x8x1xf32>
      %189 = arith.addf %186, %188 : vector<4x8x1xf32>
      %190 = vector.broadcast %182 : vector<4x8x1xf32> to vector<4x8x8xf32>
      %191 = arith.mulf %190, %arg26 : vector<4x8x8xf32>
      %192 = arith.truncf %185 : vector<4x8x8xf32> to vector<4x8x8xbf16>
      "tpu.trace_start"() <{level = 10 : i32, message = "hqk,hkd->hqd"}> : () -> ()
      %cst_87 = arith.constant dense<0.000000e+00> : vector<4x8x8xf32>
      %193 = tpu.matmul %192, %168, %cst_87 {dimension_numbers = #tpu.dot_dimension_numbers<[2], [1], [1], [2], [0, 0, 0, 1, 1, 2], [0], [0]>} : vector<4x8x8xbf16>, vector<4x8x8xbf16>, vector<4x8x8xf32> -> vector<4x8x8xf32>
      "tpu.trace_stop"() : () -> ()
      %194 = arith.addf %191, %193 : vector<4x8x8xf32>
      scf.yield %180, %189, %194 : vector<4x8x1xf32>, vector<4x8x1xf32>, vector<4x8x8xf32>
    }
    %89 = tpu.reciprocal %88#1 {approx = true} : vector<4x8x1xf32> -> vector<4x8x1xf32>
    %90 = vector.broadcast %89 : vector<4x8x1xf32> to vector<4x8x8xf32>
    %91 = arith.mulf %88#2, %90 : vector<4x8x8xf32>
    %92 = arith.truncf %91 : vector<4x8x8xf32> to vector<4x8x8xbf16>
    %c0_45 = arith.constant 0 : index
    %c0_46 = arith.constant 0 : index
    %c0_47 = arith.constant 0 : index
    %93 = vector.load %arg11[%c0_45, %c0_46, %c0_47] : memref<4x8x32xbf16, #tpu.memory_space<vmem>>, vector<4x8x32xbf16>
    "tpu.trace_start"() <{level = 10 : i32, message = "hqd,hdc->hqc"}> : () -> ()
    %cst_48 = arith.constant dense<0.000000e+00> : vector<4x8x32xf32>
    %94 = tpu.matmul %92, %93, %cst_48 {dimension_numbers = #tpu.dot_dimension_numbers<[2], [1], [1], [2], [0, 0, 0, 1, 1, 2], [0], [0]>} : vector<4x8x8xbf16>, vector<4x8x32xbf16>, vector<4x8x32xf32> -> vector<4x8x32xf32>
    "tpu.trace_stop"() : () -> ()
    %cst_49 = arith.constant dense<0.000000e+00> : vector<8x32xf32>
    %95 = vector.multi_reduction <add>, %94, %cst_49 [0] : vector<4x8x32xf32> to vector<8x32xf32>
    %c0_50 = arith.constant 0 : index
    %c0_51 = arith.constant 0 : index
    %96 = vector.load %arg12[%c0_50, %c0_51] : memref<1x32xf32, #tpu.memory_space<vmem>>, vector<1x32xf32>
    %97 = vector.shape_cast %96 : vector<1x32xf32> to vector<32xf32>
    %98 = vector.shape_cast %97 : vector<32xf32> to vector<1x32xf32>
    %99 = vector.broadcast %98 : vector<1x32xf32> to vector<8x32xf32>
    %100 = arith.addf %95, %99 : vector<8x32xf32>
    %101 = arith.addf %1, %100 : vector<8x32xf32>
    %c0_52 = arith.constant 0 : index
    %c0_53 = arith.constant 0 : index
    %102 = vector.load %arg13[%c0_52, %c0_53] : memref<1x32xf32, #tpu.memory_space<vmem>>, vector<1x32xf32>
    %103 = vector.shape_cast %102 : vector<1x32xf32> to vector<32xf32>
    %c0_54 = arith.constant 0 : index
    %c0_55 = arith.constant 0 : index
    %104 = vector.load %arg14[%c0_54, %c0_55] : memref<1x32xf32, #tpu.memory_space<vmem>>, vector<1x32xf32>
    %105 = vector.shape_cast %104 : vector<1x32xf32> to vector<32xf32>
    %cst_56 = arith.constant dense<0.000000e+00> : vector<8xf32>
    %106 = vector.multi_reduction <add>, %101, %cst_56 [1] : vector<8x32xf32> to vector<8xf32>
    %107 = vector.shape_cast %106 : vector<8xf32> to vector<8x1xf32>
    %cst_57 = arith.constant 3.200000e+01 : f32
    %108 = vector.broadcast %cst_57 : f32 to vector<8x1xf32>
    %109 = arith.divf %107, %108 : vector<8x1xf32>
    %110 = vector.broadcast %109 : vector<8x1xf32> to vector<8x32xf32>
    %111 = arith.subf %101, %110 : vector<8x32xf32>
    %112 = arith.mulf %111, %111 : vector<8x32xf32>
    %cst_58 = arith.constant dense<0.000000e+00> : vector<8xf32>
    %113 = vector.multi_reduction <add>, %112, %cst_58 [1] : vector<8x32xf32> to vector<8xf32>
    %114 = vector.shape_cast %113 : vector<8xf32> to vector<8x1xf32>
    %cst_59 = arith.constant 3.200000e+01 : f32
    %115 = vector.broadcast %cst_59 : f32 to vector<8x1xf32>
    %116 = arith.divf %114, %115 : vector<8x1xf32>
    %117 = vector.broadcast %109 : vector<8x1xf32> to vector<8x32xf32>
    %118 = arith.subf %101, %117 : vector<8x32xf32>
    %cst_60 = arith.constant 9.99999974E-6 : f32
    %119 = vector.broadcast %cst_60 : f32 to vector<8x1xf32>
    %120 = arith.addf %116, %119 : vector<8x1xf32>
    %121 = math.rsqrt %120 : vector<8x1xf32>
    %122 = vector.broadcast %121 : vector<8x1xf32> to vector<8x32xf32>
    %123 = arith.mulf %118, %122 : vector<8x32xf32>
    %124 = vector.shape_cast %103 : vector<32xf32> to vector<1x32xf32>
    %125 = vector.broadcast %124 : vector<1x32xf32> to vector<8x32xf32>
    %126 = arith.mulf %123, %125 : vector<8x32xf32>
    %127 = vector.shape_cast %105 : vector<32xf32> to vector<1x32xf32>
    %128 = vector.broadcast %127 : vector<1x32xf32> to vector<8x32xf32>
    %129 = arith.addf %126, %128 : vector<8x32xf32>
    %130 = arith.truncf %129 : vector<8x32xf32> to vector<8x32xbf16>
    %c0_61 = arith.constant 0 : index
    %c0_62 = arith.constant 0 : index
    %131 = vector.load %arg15[%c0_61, %c0_62] : memref<32x128xbf16, #tpu.memory_space<vmem>>, vector<32x128xbf16>
    %cst_63 = arith.constant dense<0.000000e+00> : vector<8x128xf32>
    %132 = tpu.matmul %130, %131, %cst_63 {dimension_numbers = #tpu.dot_dimension_numbers<[1], [0], [0], [1], [0, 0, 1, 1], [], []>} : vector<8x32xbf16>, vector<32x128xbf16>, vector<8x128xf32> -> vector<8x128xf32>
    %c0_64 = arith.constant 0 : index
    %c0_65 = arith.constant 0 : index
    %133 = vector.load %arg16[%c0_64, %c0_65] : memref<1x128xf32, #tpu.memory_space<vmem>>, vector<1x128xf32>
    %134 = vector.shape_cast %133 : vector<1x128xf32> to vector<128xf32>
    %135 = vector.shape_cast %134 : vector<128xf32> to vector<1x128xf32>
    %136 = vector.broadcast %135 : vector<1x128xf32> to vector<8x128xf32>
    %137 = arith.addf %132, %136 : vector<8x128xf32>
    %138 = arith.mulf %137, %137 : vector<8x128xf32>
    %139 = arith.mulf %137, %138 : vector<8x128xf32>
    %cst_66 = arith.constant 4.471500e-02 : f32
    %140 = vector.broadcast %cst_66 : f32 to vector<8x128xf32>
    %141 = arith.mulf %140, %139 : vector<8x128xf32>
    %142 = arith.addf %137, %141 : vector<8x128xf32>
    %cst_67 = arith.constant 0.797884583 : f32
    %143 = vector.broadcast %cst_67 : f32 to vector<8x128xf32>
    %144 = arith.mulf %143, %142 : vector<8x128xf32>
    %145 = math.tanh %144 : vector<8x128xf32>
    %cst_68 = arith.constant 1.000000e+00 : f32
    %146 = vector.broadcast %cst_68 : f32 to vector<8x128xf32>
    %147 = arith.addf %146, %145 : vector<8x128xf32>
    %cst_69 = arith.constant 5.000000e-01 : f32
    %148 = vector.broadcast %cst_69 : f32 to vector<8x128xf32>
    %149 = arith.mulf %148, %147 : vector<8x128xf32>
    %150 = arith.mulf %137, %149 : vector<8x128xf32>
    %151 = arith.truncf %150 : vector<8x128xf32> to vector<8x128xbf16>
    %c0_70 = arith.constant 0 : index
    %c0_71 = arith.constant 0 : index
    %152 = vector.load %arg17[%c0_70, %c0_71] : memref<128x32xbf16, #tpu.memory_space<vmem>>, vector<128x32xbf16>
    %cst_72 = arith.constant dense<0.000000e+00> : vector<8x32xf32>
    %153 = tpu.matmul %151, %152, %cst_72 {dimension_numbers = #tpu.dot_dimension_numbers<[1], [0], [0], [1], [0, 0, 1, 1], [], []>} : vector<8x128xbf16>, vector<128x32xbf16>, vector<8x32xf32> -> vector<8x32xf32>
    %c0_73 = arith.constant 0 : index
    %c0_74 = arith.constant 0 : index
    %154 = vector.load %arg18[%c0_73, %c0_74] : memref<1x32xf32, #tpu.memory_space<vmem>>, vector<1x32xf32>
    %155 = vector.shape_cast %154 : vector<1x32xf32> to vector<32xf32>
    %156 = vector.shape_cast %155 : vector<32xf32> to vector<1x32xf32>
    %157 = vector.broadcast %156 : vector<1x32xf32> to vector<8x32xf32>
    %158 = arith.addf %153, %157 : vector<8x32xf32>
    %159 = arith.addf %101, %158 : vector<8x32xf32>
    %c0_75 = arith.constant 0 : index
    %c0_76 = arith.constant 0 : index
    %c0_77 = arith.constant 0 : index
    %160 = vector.load %arg20[%c0_75, %c0_76, %c0_77] : memref<1x8x32xf32, #tpu.memory_space<vmem>>, vector<1x8x32xf32>
    %161 = vector.shape_cast %160 : vector<1x8x32xf32> to vector<8x32xf32>
    %162 = vector.shape_cast %159 : vector<8x32xf32> to vector<1x8x32xf32>
    tpu.vector_store %arg20[%c0_75, %c0_76, %c0_77], %162 {strides = array<i32>} : memref<1x8x32xf32, #tpu.memory_space<vmem>>, vector<1x8x32xf32>,
    return
  }
  func.func @transform_0(%arg0: i32, %arg1: i32) -> (i32, i32, i32) {
    %c0_i32 = arith.constant 0 : i32
    %c0_i32_0 = arith.constant 0 : i32
    return %arg0, %arg1, %c0_i32 : i32, i32, i32
  }
  func.func @transform_1(%arg0: i32, %arg1: i32) -> (i32, i32) {
    %c0_i32 = arith.constant 0 : i32
    %c0_i32_0 = arith.constant 0 : i32
    %c0_i32_1 = arith.constant 0 : i32
    return %c0_i32, %c0_i32_0 : i32, i32
  }
  func.func @transform_2(%arg0: i32, %arg1: i32) -> (i32, i32) {
    %c0_i32 = arith.constant 0 : i32
    %c0_i32_0 = arith.constant 0 : i32
    %c0_i32_1 = arith.constant 0 : i32
    return %c0_i32, %c0_i32_0 : i32, i32
  }
  func.func @transform_3(%arg0: i32, %arg1: i32) -> (i32, i32, i32) {
    %c0_i32 = arith.constant 0 : i32
    %c0_i32_0 = arith.constant 0 : i32
    %c0_i32_1 = arith.constant 0 : i32
    %c0_i32_2 = arith.constant 0 : i32
    return %c0_i32, %c0_i32_0, %c0_i32_1 : i32, i32, i32
  }
  func.func @transform_4(%arg0: i32, %arg1: i32) -> (i32, i32, i32) {
    %c0_i32 = arith.constant 0 : i32
    %c0_i32_0 = arith.constant 0 : i32
    %c0_i32_1 = arith.constant 0 : i32
    %c0_i32_2 = arith.constant 0 : i32
    return %c0_i32, %c0_i32_0, %c0_i32_1 : i32, i32, i32
  }
  func.func @transform_5(%arg0: i32, %arg1: i32) -> (i32, i32, i32) {
    %c0_i32 = arith.constant 0 : i32
    %c0_i32_0 = arith.constant 0 : i32
    %c0_i32_1 = arith.constant 0 : i32
    %c0_i32_2 = arith.constant 0 : i32
    return %c0_i32, %c0_i32_0, %c0_i32_1 : i32, i32, i32
  }
  func.func @transform_6(%arg0: i32, %arg1: i32) -> (i32, i32, i32) {
    %c0_i32 = arith.constant 0 : i32
    %c0_i32_0 = arith.constant 0 : i32
    %c0_i32_1 = arith.constant 0 : i32
    %c0_i32_2 = arith.constant 0 : i32
    return %c0_i32, %c0_i32_0, %c0_i32_1 : i32, i32, i32
  }
  func.func @transform_7(%arg0: i32, %arg1: i32) -> (i32, i32, i32) {
    %c0_i32 = arith.constant 0 : i32
    %c0_i32_0 = arith.constant 0 : i32
    %c0_i32_1 = arith.constant 0 : i32
    %c0_i32_2 = arith.constant 0 : i32
    return %c0_i32, %c0_i32_0, %c0_i32_1 : i32, i32, i32
  }
  func.func @transform_8(%arg0: i32, %arg1: i32) -> (i32, i32, i32) {
    %c0_i32 = arith.constant 0 : i32
    %c0_i32_0 = arith.constant 0 : i32
    %c0_i32_1 = arith.constant 0 : i32
    %c0_i32_2 = arith.constant 0 : i32
    return %c0_i32, %c0_i32_0, %c0_i32_1 : i32, i32, i32
  }
  func.func @transform_9(%arg0: i32, %arg1: i32) -> (i32, i32, i32) {
    %c0_i32 = arith.constant 0 : i32
    %c0_i32_0 = arith.constant 0 : i32
    %c0_i32_1 = arith.constant 0 : i32
    %c0_i32_2 = arith.constant 0 : i32
    return %c0_i32, %c0_i32_0, %c0_i32_1 : i32, i32, i32
  }
  func.func @transform_10(%arg0: i32, %arg1: i32) -> (i32, i32) {
    %c0_i32 = arith.constant 0 : i32
    %c0_i32_0 = arith.constant 0 : i32
    %c0_i32_1 = arith.constant 0 : i32
    return %c0_i32, %c0_i32_0 : i32, i32
  }
  func.func @transform_11(%arg0: i32, %arg1: i32) -> (i32, i32) {
    %c0_i32 = arith.constant 0 : i32
    %c0_i32_0 = arith.constant 0 : i32
    %c0_i32_1 = arith.constant 0 : i32
    return %c0_i32, %c0_i32_0 : i32, i32
  }
  func.func @transform_12(%arg0: i32, %arg1: i32) -> (i32, i32) {
    %c0_i32 = arith.constant 0 : i32
    %c0_i32_0 = arith.constant 0 : i32
    %c0_i32_1 = arith.constant 0 : i32
    return %c0_i32, %c0_i32_0 : i32, i32
  }
  func.func @transform_13(%arg0: i32, %arg1: i32) -> (i32, i32) {
    %c0_i32 = arith.constant 0 : i32
    %c0_i32_0 = arith.constant 0 : i32
    %c0_i32_1 = arith.constant 0 : i32
    return %c0_i32, %c0_i32_0 : i32, i32
  }
  func.func @transform_14(%arg0: i32, %arg1: i32) -> (i32, i32) {
    %c0_i32 = arith.constant 0 : i32
    %c0_i32_0 = arith.constant 0 : i32
    %c0_i32_1 = arith.constant 0 : i32
    return %c0_i32, %c0_i32_0 : i32, i32
  }
  func.func @transform_15(%arg0: i32, %arg1: i32) -> (i32, i32) {
    %c0_i32 = arith.constant 0 : i32
    %c0_i32_0 = arith.constant 0 : i32
    %c0_i32_1 = arith.constant 0 : i32
    return %c0_i32, %c0_i32_0 : i32, i32
  }
  func.func @transform_16(%arg0: i32, %arg1: i32) -> (i32, i32) {
    %c0_i32 = arith.constant 0 : i32
    %c0_i32_0 = arith.constant 0 : i32
    %c0_i32_1 = arith.constant 0 : i32
    return %c0_i32, %c0_i32_0 : i32, i32
  }
  func.func @transform_17(%arg0: i32, %arg1: i32) -> (i32, i32, i32) {
    %c0_i32 = arith.constant 0 : i32
    %c0_i32_0 = arith.constant 0 : i32
    %c0_i32_1 = arith.constant 0 : i32
    %c0_i32_2 = arith.constant 0 : i32
    return %c0_i32, %c0_i32_0, %c0_i32_1 : i32, i32, i32
  }
  func.func @transform_18(%arg0: i32, %arg1: i32) -> (i32, i32, i32) {
    %c0_i32 = arith.constant 0 : i32
    %c0_i32_0 = arith.constant 0 : i32
    return %arg0, %arg1, %c0_i32 : i32, i32, i32
  }
}

</mosaic_0001>

<bundles_post_ra>
// kernel: tpu_custom_call.1
= control target key start
LH: loop header
LB: loop body
LE: loop exit
PB: predicated region body
PF: predicated region fallthrough
CT: control target
= control target key end

     0   :  { %s3567_s0 = inlined_call_operand.vmem [shape: f32[2,16,32], index: 0, kind: input, shape index: {}]   ;;  %s3568_s1 = inlined_call_operand.vmem [shape: f32[1,32], index: 1, kind: input, shape index: {}]   ;;  %s3569_s2 = inlined_call_operand.vmem [shape: f32[1,32], index: 2, kind: input, shape index: {}]   ;;  %s3570_s3 = inlined_call_operand.vmem [shape: bf16[4,32,8], index: 3, kind: input, shape index: {}]   ;;  %s3571_s4 = inlined_call_operand.vmem [shape: f32[4,1,8], index: 4, kind: input, shape index: {}]   ;;  %s3572_s5 = inlined_call_operand.vmem [shape: bf16[4,32,8], index: 5, kind: input, shape index: {}]   ;;  %s3573_s6 = inlined_call_operand.vmem [shape: f32[4,1,8], index: 6, kind: input, shape index: {}]   ;;  %s3574_s7 = inlined_call_operand.vmem [shape: bf16[4,32,8], index: 7, kind: input, shape index: {}]   ;;  %s3575_s8 = inlined_call_operand.vmem [shape: f32[4,1,8], index: 8, kind: input, shape index: {}]   ;;  %s3576_s9 = inlined_call_operand.vmem [shape: bf16[4,8,32], index: 9, kind: input, shape index: {}]   ;;  %s3577_s10 = inlined_call_operand.vmem [shape: f32[1,32], index: 10, kind: input, shape index: {}]   ;;  %s3578_s11 = inlined_call_operand.vmem [shape: f32[1,32], index: 11, kind: input, shape index: {}]   ;;  %s3579_s12 = inlined_call_operand.vmem [shape: f32[1,32], index: 12, kind: input, shape index: {}]   ;;  %s3580_s13 = inlined_call_operand.vmem [shape: bf16[32,128], index: 13, kind: input, shape index: {}]   ;;  %s3581_s14 = inlined_call_operand.vmem [shape: f32[1,128], index: 14, kind: input, shape index: {}]   ;;  %s3582_s15 = inlined_call_operand.vmem [shape: bf16[128,32], index: 15, kind: input, shape index: {}]   ;;  %s3583_s16 = inlined_call_operand.vmem [shape: f32[1,32], index: 16, kind: input, shape index: {}]   ;;  %s3584_s17 = inlined_call_operand.vmem [shape: f32[4,1,1], index: 17, kind: input, shape index: {}]   ;;  %s3585_s18 = inlined_call_operand.hbm [shape: f32[2,16,32], index: 18, kind: output, shape index: {}]  }
   0x1   :  { %3596 = sst [smem:[#allocation14_spill]] %s3567_s0 }
   0x2   :  { %3597 = sst [smem:[#allocation15_spill]] %s3568_s1 }
   0x3   :  { %3598 = sst [smem:[#allocation16_spill]] %s3569_s2 }
   0x4   :  { %3599 = sst [smem:[#allocation17_spill]] %s3570_s3 }
   0x5   :  { %3600 = sst [smem:[#allocation18_spill]] %s3571_s4 }
   0x6   :  { %3601 = sst [smem:[#allocation19_spill]] %s3572_s5 }
   0x7   :  { %3602 = sst [smem:[#allocation20_spill]] %s3573_s6 }
   0x8   :  { %3603 = sst [smem:[#allocation21_spill]] %s3583_s16 }
   0x9   :  { %3604 = sst [smem:[#allocation22_spill]] %s3585_s18 }
   0xa   :  { %23 = vsyncpa [#allocation5], 0 }
   0xb   :  { %25 = vsyncpa [#allocation5 + $0x1], 0  ;;  %s2897_s27 = smov 0   ;;  %s2899_s28 = smov 0  }
   0xc   :  { %s2901_s29 = smov 0   ;;  %s2903_s30 = smov 0  }
   0xd   :  { %s2905_s0 = smov 0   ;;  %s2907_s19 = smov 0  }
   0xe   :  { %s2909_s1 = smov 0   ;;  %s2911_s20 = smov 0  }
   0xf LB: > { %3605 = sst [smem:[#allocation7_spill]] %s2685_s27  ;;  %s1997_s21 = sadd.s32 4294967295, %s2713_s20   ;;  %s2713_s20 = sphi %s2911_s20, %s31_s20   ;;  %s2709_s1 = sphi %s2909_s1, %s3660_s1   ;;  %s2705_s19 = sphi %s2907_s19, %s3659_s19   ;;  %s2701_s0 = sphi %s2905_s0, %s3658_s0   ;;  %s2697_s30 = sphi %s2903_s30, %s3657_s30   ;;  %s2693_s29 = sphi %s2901_s29, %s3663_s29   ;;  %s2689_s28 = sphi %s2899_s28, %s3662_s28   ;;  %s2685_s27 = sphi %s2897_s27, %s3661_s27  }
  0x10   : > { %3606 = sst [smem:[#allocation8_spill]] %s2705_s19  ;;  %s1998_s22 = sadd.s32 4294967294, %s2713_s20  }
  0x11   : > { %3607 = sst [smem:[#allocation9_spill]] %s2709_s1  ;;  %s40_s2 = sadd.s32 1, %s2705_s19 }
  0x12   : > { %p41_p0 = scmp.ge.s32.totalorder %s40_s2, 2  ;;  %s43_s23 = sadd.s32 1, %s2709_s1 }
  0x13   : > { %p447_p1 = scmp.ne.s32.totalorder %s2693_s29, %s2689_s28  ;;  %p448_p2 = scmp.eq.s32.totalorder %s1997_s21, 3 }
  0x14   : > { %s3665_s2 = smov (%p41_p0, %s40_s2), 0  ;;  %s3667_s23 = smov (!%p41_p0, %s43_s23), %s2709_s1 }
  0x15   : > { %3608 = sst [smem:[#allocation10_spill]] %s3665_s2  ;;  %s433_s24 = ssub.s32 %s2705_s19, %s3665_s2 }
  0x16   : > { %p2948_p3 = por %p448_p2, %p447_p1  ;;  %p45_p4 = scmp.ge.s32.totalorder %s3667_s23, 2 }
  0x17   : > { %p453_p5 = scmp.ne.s32.totalorder %s2689_s28, %s2685_s27  ;;  %p454_p6 = scmp.eq.s32.totalorder %s1998_s22, 3 }
  0x18   : > { %s3609_s25 = scalar_select %p2948_p3, 1, 0 }
  0x19   : > { %p2001_p7 = scmp.ge.s32.totalorder %s2713_s20, 1  ;;  %s3669_s23 = smov (%p45_p4, %s3667_s23), 0 }
  0x1a   : > { %3610 = sst [smem:[#allocation11_spill]] %s3609_s25  ;;  %p2957_p8 = por %p454_p6, %p453_p5 }
  0x1b   : > { %3611 = sst [smem:[#allocation12_spill]] %s3669_s23  ;;  %p534_p9 = scmp.lt.s32.totalorder %s2713_s20, 5 }
  0x1c   : > { %s3612_s26 = scalar_select %p2957_p8, 1, 0 }
  0x1d   : > { %s432_s21 = ssub.s32 %s2709_s1, %s3669_s23  ;;  %s437_s18 = sadd.s32 1, %s2693_s29 }
  0x1e   : > { %3613 = sst [smem:[#allocation13_spill]] %s3612_s26  ;;  %s434_s16 = sor.u32 %s433_s24, %s432_s21 }
  0x1f   : > { %p535_p10 = pnand %p2001_p7, %p534_p9  ;;  %p435_p11 = scmp.eq.s32.totalorder %s434_s16, 0 }
  0x20   : > { %p591_p12 = scmp.lt.s32.totalorder (!%p535_p10), %s2701_s0, 1  ;;  %p593_p13 = scmp.lt.s32.totalorder (!%p535_p10), %s2697_s30, 1 }
  0x21   : > { %s2966_s2 = scalar_select %p435_p11, %s2693_s29, %s437_s18  }
  0x22   : > { %538 = sbr.rel (%p535_p10) target bundleno = 2035 (0x7f3), region = 92  ;;  %s3614_s24 = sld [smem:[#allocation14_spill]] (!%p535_p10) }
  0x23   : > { %s3595_s16 = sand.u32 (!%p535_p10), 1, %s2689_s28   ;;  %s3615_s3 = sld [smem:[#allocation17_spill]] (!%p535_p10) }
  0x24   : > { %s2987_s18 = sshll.u32 (!%p535_p10), %s3595_s16, 3  ;;  %s3616_s5 = sld [smem:[#allocation19_spill]] (!%p535_p10) }
  0x25   : > { %s3618_s16 = sld [smem:[#allocation16_spill]] (!%p535_p10)  ;;  %p2124_p0 = scmp.le.s32.totalorder (!%p535_p10), %s2697_s30, 0 }
  0x26   : > { %s3619_s6 = sld [smem:[#allocation20_spill]] (!%p535_p10) }
  0x27   : > { %s592_s22 = scalar_select %p591_p12, %s2701_s0, 1  ;;  %vm603_vm0 = vcmask 261120   ;;  %v2799_v2 = vmov 32.0   ;;  %v2204_v46 = vld [vmem:[%s3574_s7 + $0x8] sm:$0xff]  ;;  %v2206_v47 = vld [vmem:[%s3574_s7 + $0x18] sm:$0xff]  ;;  %v2203_v50 = vld [vmem:[%s3574_s7] sm:$0xff] }
  0x28   : > { %s594_s19 = scalar_select %p593_p13, %s2697_s30, 1  ;;  %2488 = vrcp.f32 %v2799_v2  ;;  %v2208_v48 = vld [vmem:[%s3574_s7 + $0x28] sm:$0xff]  ;;  %v2210_v49 = vld [vmem:[%s3574_s7 + $0x38] sm:$0xff]  ;;  %v2205_v51 = vld [vmem:[%s3574_s7 + $0x10] sm:$0xff]  ;;  %v2800_v57 = vmov 0   ;;  %vm1056_vm5 = vcmask 60416  }
  0x29   : > { %s2003_s27 = sshll.u32 %s592_s22, 1  ;;  %v2188_v14 = vld [vmem:[%s3615_s3 + $0x8] sm:$0xff]  ;;  %v2190_v15 = vld [vmem:[%s3615_s3 + $0x18] sm:$0xff]  ;;  %v2187_v18 = vld [vmem:[%s3615_s3] sm:$0xff]  ;;  %2467 = vset.pattern.permute.xlu1 %v2800_v57  ;;  %2468 = vset.pattern.permute.xlu2 %v2800_v57  ;;  %vm1112_vm6 = vcmask 64512   ;;  %s3620_s4 = sld [smem:[#allocation18_spill]] }
  0x2a   : > { %s596_s25 = sadd.s32 %s2003_s27, %s594_s19  ;;  %v2192_v16 = vld [vmem:[%s3615_s3 + $0x28] sm:$0xff]  ;;  %v2194_v17 = vld [vmem:[%s3615_s3 + $0x38] sm:$0xff]  ;;  %695 = vmatpush.bf16.msra.mxu0 %v2188_v14  ;;  %720 = vmatpush.bf16.msra.mxu1 %v2190_v15  ;;  %v2189_v19 = vld [vmem:[%s3615_s3 + $0x10] sm:$0xff]  ;;  %s2211_s19 = sshll.u32 %s2697_s30, 4  ;;  %vm1232_vm7 = vcmask 1043456  }
  0x2b   : > { %s2004_s26 = sshll.u32 %s596_s25, 3  ;;  %745 = vmatpush.bf16.msra.mxu2 %v2192_v16  ;;  %770 = vmatpush.bf16.msra.mxu3 %v2194_v17  ;;  %v2191_v20 = vld [vmem:[%s3615_s3 + $0x20] sm:$0xff]  ;;  %v2193_v21 = vld [vmem:[%s3615_s3 + $0x30] sm:$0xff]  ;;  %v2196_v23 = vld [vmem:[%s3616_s5 + $0x8] sm:$0xff]  ;;  %s3617_s25 = sld [smem:[#allocation15_spill]] }
  0x2c   : > { %s598_s21 = scalar_lea.vmem %s3614_s24, %s2004_s26  ;;  %v2198_v24 = vld [vmem:[%s3616_s5 + $0x18] sm:$0xff]  ;;  %v2200_v25 = vld [vmem:[%s3616_s5 + $0x28] sm:$0xff]  ;;  %v2195_v28 = vld [vmem:[%s3616_s5] sm:$0xff]  ;;  %2469 = vset.pattern.permute.xlu0 %v2800_v57  ;;  %s1055_s24 = scalar_lea.vmem [#allocation2], %s2211_s19 }
  0x2d   : > { %v2975_v0 = vld [vmem:[%s598_s21] sm:$0xff]  ;;  %v2202_v27 = vld [vmem:[%s3616_s5 + $0x38] sm:$0xff]  ;;  %v2197_v29 = vld [vmem:[%s3616_s5 + $0x10] sm:$0xff]  ;;  %s1062_s23 = scalar_lea.vmem [#allocation3], %s2211_s19 }
  0x2e   : > { %v604_v1 = vsel %vm603_vm0, %v2975_v0, 0.0  ;;  %v2489_v3 = vpop.eup %2488  ;;  %696 = vmatpush.bf16.msra.mxu0 %v2187_v18  ;;  %721 = vmatpush.bf16.msra.mxu1 %v2189_v19  ;;  %v2199_v31 = vld [vmem:[%s3616_s5 + $0x20] sm:$0xff]  ;;  %v2201_v32 = vld [vmem:[%s3616_s5 + $0x30] sm:$0xff] }
  0x2f   : > { %605 = vadd.xlane.f32.xlu0 %v604_v1  ;;  %v608_v4 = vmul.f32 32.0, %v2489_v3  ;;  %vm612_vm1 = vweird.f32 %v2489_v3  ;;  %746 = vmatpush.bf16.msra.mxu2 %v2191_v20  ;;  %v2471_v41 = vld [vmem:[%s3618_s16] ss:$0 sm:$0xff]  ;;  %v2209_v53 = vld [vmem:[%s3574_s7 + $0x30] sm:$0xff]  ;;  %v2484_v56 = vld [vmem:[%s3584_s17 + $0x2] ss:$0 sm:$0xff] }
  0x30   : > { %771 = vmatpush.bf16.msra.mxu3 %v2193_v21  ;;  %v2207_v52 = vld [vmem:[%s3574_s7 + $0x20] sm:$0xff]  ;;  %1094 = vperm.xlu1 %2467, %v2484_v56  }
  0x31   : > { %v609_v5 = vsub.f32 1.0, %v608_v4  ;;  %v2470_v39 = vld [vmem:[%s3617_s25] ss:$0 sm:$0xff]  ;;  %v2485_v62 = vld [vmem:[%s3584_s17 + $0x3] ss:$0 sm:$0xff]  ;;  %s3259_s25 = smov (!%p2124_p0), 0  }
  0x32   : > { %827 = vmatpush.bf16.msrb.mxu0 %v2196_v23  ;;  %852 = vmatpush.bf16.msrb.mxu1 %v2198_v24  ;;  %v2476_v63 = vld [vmem:[%s3619_s6] ss:$0 sm:$0xff]  ;;  %v2477_v1 = vld [vmem:[%s3619_s6 + $0x1] ss:$0 sm:$0xff]  ;;  %v3095_v2 = vld [vmem:[%s3584_s17 + $0x2] sm:$0x1] }
  0x33   : > { %v610_v6 = vmul.f32 %v2489_v3, %v609_v5  ;;  %877 = vmatpush.bf16.msrb.mxu2 %v2200_v25  ;;  %v3101_v5 = vld [vmem:[%s3584_s17 + $0x3] sm:$0x1]  ;;  %v2472_v14 = vld [vmem:[%s3620_s4] ss:$0 sm:$0xff]  ;;  %v2473_v17 = vld [vmem:[%s3620_s4 + $0x1] ss:$0 sm:$0xff] }
  0x34   : > { %902 = vmatpush.bf16.msrb.mxu3 %v2202_v27  ;;  %v2478_v18 = vld [vmem:[%s3619_s6 + $0x2] ss:$0 sm:$0xff]  ;;  %v2479_v19 = vld [vmem:[%s3619_s6 + $0x3] ss:$0 sm:$0xff] }
  0x35   : > { %v611_v7 = vadd.f32 %v2489_v3, %v610_v6  ;;  %v3106_v6 = vld [vmem:[%s3584_s17] sm:$0x1] }
  0x36   : > { %828 = vmatpush.bf16.msrb.mxu0 %v2195_v28  ;;  %853 = vmatpush.bf16.msrb.mxu1 %v2197_v29 }
  0x37   : > { %v2979_v8 = vsel %vm612_vm1, %v2489_v3, %v611_v7  ;;  %878 = vmatpush.bf16.msrb.mxu2 %v2199_v31  ;;  %v2486_v7 = vld [vmem:[%s3584_s17] ss:$0 sm:$0xff]  ;;  %v2474_v31 = vld [vmem:[%s3620_s4 + $0x2] ss:$0 sm:$0xff] }
  0x38   : > { %903 = vmatpush.bf16.msrb.mxu3 %v2201_v32  ;;  %1098 = vperm.xlu1 %2467, %v2485_v62   ;;  %v2475_v32 = vld [vmem:[%s3620_s4 + $0x3] ss:$0 sm:$0xff] }
  0x39   : > { %1086 = vperm.xlu2 %2468, %v2486_v7  }
  0xa2   : > { %v606_v9 = vpop.xlane.xlu0 %605 }
  0xa3   : > { %v614_v10 = vmul.f32 %v2979_v8, %v606_v9 }
  0xa5   : > { %v615_v11 = vsub.f32 %v2975_v0, %v614_v10 }
  0xa7   : > { %v616_v12 = vmul.f32 %v615_v11, %v615_v11 }
  0xa9   : > { %v617_v13 = vsel %vm603_vm0, %v616_v12, 0.0 }
  0xaa   : > { %618 = vadd.xlane.f32.xlu0 %v617_v13 }
 0x11d   : > { %v619_v22 = vpop.xlane.xlu0 %618 }
 0x11e   : > { %v620_v26 = vmul.f32 %v619_v22, %v2979_v8  ;;  %v2487_v22 = vld [vmem:[%s3584_s17 + $0x1] ss:$0 sm:$0xff] }
 0x11f   : > { %1090 = vperm.xlu2 %2468, %v2487_v22  }
 0x120   : > { %v621_v30 = vadd.f32 1e-05, %v620_v26 }
 0x122   : > { %2490 = vrsqrt.f32 %v621_v30  ;;  %vm628_vm3 = vweird.f32 %v621_v30 }
 0x128   : > { %v2491_v33 = vpop.eup %2490 }
 0x129   : > { %v623_v34 = vmul.f32 %v2491_v33, %v621_v30  ;;  %vm629_vm2 = vweird.f32 %v2491_v33 }
 0x12a   : > { %vm630_vm4 = vmor %vm628_vm3, %vm629_vm2 }
 0x12b   : > { %v624_v35 = vmul.f32 %v2491_v33, %v623_v34 }
 0x12d   : > { %v625_v36 = vmul.f32 0.5, %v624_v35 }
 0x12f   : > { %v626_v37 = vsub.f32 1.5, %v625_v36 }
 0x131   : > { %v627_v38 = vmul.f32 %v2491_v33, %v626_v37 }
 0x133   : > { %v631_v40 = vsel %vm630_vm4, %v2491_v33, %v627_v38 }
 0x134   : > { %v632_v42 = vmul.f32 %v631_v40, %v615_v11  ;;  %v3114_v11 = vld [vmem:[%s3584_s17 + $0x1] sm:$0x1] }
 0x135   : > { %v2481_v40 = vld [vmem:[%s3575_s8 + $0x1] ss:$0 sm:$0xff] }
 0x136   : > { %v636_v43 = vmul.f32 %v2470_v39, %v632_v42  ;;  %v2480_v39 = vld [vmem:[%s3575_s8] ss:$0 sm:$0xff] }
 0x138   : > { %v640_v44 = vadd.f32 %v2471_v41, %v636_v43 }
 0x13a   : > { %v641_v45 = vpack.c.bf16 %v640_v44, %v640_v44 }
 0x13c   : > { %2013 = vmatmul.msk.bf16.vlgmr.msra.gmra.mxu0 %vm603_vm0, %v641_v45  ;;  %2022 = vmatmul.msk.bf16.vlgmr.msra.gmra.mxu1 %vm603_vm0, %v641_v45 }
 0x13d   : > { %2031 = vmatmul.msk.bf16.vlgmr.msra.gmra.mxu2 %vm603_vm0, %v641_v45  ;;  %2040 = vmatmul.msk.bf16.vlgmr.msra.gmra.mxu3 %vm603_vm0, %v641_v45 }
 0x13e   : > { %959 = vmatpush.bf16.msra.mxu0 %v2204_v46  ;;  %984 = vmatpush.bf16.msra.mxu1 %v2206_v47 }
 0x13f   : > { %1009 = vmatpush.bf16.msra.mxu2 %v2208_v48  ;;  %1034 = vmatpush.bf16.msra.mxu3 %v2210_v49 }
 0x142   : > { %960 = vmatpush.bf16.msra.mxu0 %v2203_v50  ;;  %985 = vmatpush.bf16.msra.mxu1 %v2205_v51 }
 0x143   : > { %1010 = vmatpush.bf16.msra.mxu2 %v2207_v52  ;;  %1035 = vmatpush.bf16.msra.mxu3 %v2209_v53  ;;  %v2482_v53 = vld [vmem:[%s3575_s8 + $0x2] ss:$0 sm:$0xff] }
 0x14c   : > { %2049 = vmatmul.msk.bf16.vlgmr.msrb.gmra.mxu0 %vm603_vm0, %v641_v45  ;;  %2058 = vmatmul.msk.bf16.vlgmr.msrb.gmra.mxu1 %vm603_vm0, %v641_v45 }
 0x14d   : > { %2067 = vmatmul.msk.bf16.vlgmr.msrb.gmra.mxu2 %vm603_vm0, %v641_v45  ;;  %2076 = vmatmul.msk.bf16.vlgmr.msrb.gmra.mxu3 %vm603_vm0, %v641_v45 }
 0x15c   : > { %2085 = vmatmul.msk.bf16.vlgmr.msra.gmra.mxu0 %vm603_vm0, %v641_v45  ;;  %2094 = vmatmul.msk.bf16.vlgmr.msra.gmra.mxu1 %vm603_vm0, %v641_v45 }
 0x15d   : > { %2103 = vmatmul.msk.bf16.vlgmr.msra.gmra.mxu2 %vm603_vm0, %v641_v45  ;;  %2112 = vmatmul.msk.bf16.vlgmr.msra.gmra.mxu3 %vm603_vm0, %v641_v45 }
 0x1b9   : > { %v698_v54 = vpop.f32.mrf.mxu0  ;;  %v723_v55 = vpop.f32.mrf.mxu1 }
 0x1ba   : > { %v699_v25 = vadd.f32 %v2472_v14, %v698_v54  ;;  %v724_v26 = vadd.f32 %v2473_v17, %v723_v55  ;;  %v2483_v54 = vld [vmem:[%s3575_s8 + $0x3] ss:$0 sm:$0xff] }
 0x1bc   : > { %v3143_v35 = vpack.c.bf16 %v699_v25, %v699_v25  ;;  %v3145_v36 = vpack.c.bf16 %v724_v26, %v724_v26 }
 0x1c0   : > { %v748_v58 = vpop.f32.mrf.mxu2  ;;  %v773_v59 = vpop.f32.mrf.mxu3 }
 0x1c1   : > { %v700_v60 = vpop.f32.mrf.mxu0  ;;  %v725_v61 = vpop.f32.mrf.mxu1  ;;  %v749_v41 = vadd.f32 %v2474_v31, %v748_v58  ;;  %v774_v42 = vadd.f32 %v2475_v32, %v773_v59 }
 0x1c3   : > { %v3161_v49 = vpack.c.bf16 %v749_v41, %v749_v41  ;;  %v3163_v50 = vpack.c.bf16 %v774_v42, %v774_v42 }
 0x1c8   : > { %v750_v3 = vpop.f32.mrf.mxu2  ;;  %v775_v4 = vpop.f32.mrf.mxu3 }
 0x1c9   : > { %v830_v9 = vpop.f32.mrf.mxu0  ;;  %v855_v10 = vpop.f32.mrf.mxu1 }
 0x1ca   : > { %v831_v12 = vadd.f32 %v2476_v63, %v830_v9  ;;  %v856_v13 = vadd.f32 %v2477_v1, %v855_v10  ;;  %v1067_v10 = vlaneseq }
 0x1cc   : > { %v1045_v15 = vpack.c.bf16 %v831_v12, %v831_v12  ;;  %v1046_v16 = vpack.c.bf16 %v856_v13, %v856_v13  ;;  %v1068_v12 = vshrl.u32 %v1067_v10, 7  ;;  %v1070_v13 = vand.u32 127, %v1067_v10 }
 0x1ce   : > { %1057 = vst.msk [vmem:[%s1055_s24] sm:$0xf] %vm1056_vm5, %v1045_v15  ;;  %v1117_v20 = vsel %vm1112_vm6, %v1045_v15, 0  ;;  %v1136_v21 = vsel %vm1112_vm6, %v1046_v16, 0  ;;  %v1075_v14 = vsub.s32 %v1070_v13, %v1068_v12  ;;  %vm1105_vm8 = vcmp.le.s32.totalorder %v1070_v13, %v1068_v12 }
 0x1cf   : > { %1058 = vst.msk [vmem:[%s1055_s24 + $0x4] sm:$0xf] %vm1056_vm5, %v1046_v16  ;;  %1126 = vmatpush.bf16.xpose.msrb.mxu0 %v1117_v20  ;;  %1145 = vmatpush.bf16.xpose.msrb.mxu1 %v1136_v21  ;;  %v1087_v16 = vpop.permute.xlu2 %1086 }
 0x1d0   : > { %v880_v23 = vpop.f32.mrf.mxu2  ;;  %v905_v24 = vpop.f32.mrf.mxu3  ;;  %v1076_v15 = vcvt.s32.f32 %v1075_v14 }
 0x1d1   : > { %v881_v27 = vadd.f32 %v2478_v18, %v880_v23  ;;  %v906_v28 = vadd.f32 %v2479_v19, %v905_v24  ;;  %v832_v29 = vpop.f32.mrf.mxu0  ;;  %v857_v30 = vpop.f32.mrf.mxu1 }
 0x1d2   : > { %v3185_v17 = vmul.f32 %v1087_v16, %v1076_v15  ;;  %v1095_v18 = vpop.permute.xlu1 %1094 }
 0x1d3   : > { %v1047_v33 = vpack.c.bf16 %v881_v27, %v881_v27  ;;  %v1048_v34 = vpack.c.bf16 %v906_v28, %v906_v28  ;;  %v3190_v25 = vmul.f32 %v1095_v18, %v1076_v15 }
 0x1d4   : > { %v1108_v19 = vsel %vm1105_vm8, %v3185_v17, -1e+30 }
 0x1d5   : > { %1059 = vst.msk [vmem:[%s1055_s24 + $0x8] sm:$0xf] %vm1056_vm5, %v1047_v33  ;;  %v1155_v37 = vsel %vm1112_vm6, %v1047_v33, 0  ;;  %v1174_v38 = vsel %vm1112_vm6, %v1048_v34, 0  ;;  %v1110_v31 = vsel %vm1105_vm8, %v3190_v25, -1e+30 }
 0x1d6   : > { %1060 = vst.msk [vmem:[%s1055_s24 + $0xc] sm:$0xf] %vm1056_vm5, %v1048_v34  ;;  %1164 = vmatpush.bf16.xpose.msrb.mxu2 %v1155_v37  ;;  %1183 = vmatpush.bf16.xpose.msrb.mxu3 %v1174_v38 }
 0x1d7   : > { %2116 = vmatmul.msk.bf16.vlgmr.msrb.gmra.mxu0 %vm1112_vm6, %v3143_v35  ;;  %2117 = vmatmul.msk.bf16.vlgmr.msrb.gmra.mxu1 %vm1112_vm6, %v3145_v36  ;;  %v1091_v29 = vpop.permute.xlu2 %1090 }
 0x1d8   : > { %v882_v43 = vpop.f32.mrf.mxu2  ;;  %v907_v44 = vpop.f32.mrf.mxu3  ;;  %v3194_v30 = vmul.f32 %v1091_v29, %v1076_v15 }
 0x1d9   : > { %v962_v45 = vpop.f32.mrf.mxu0  ;;  %v987_v46 = vpop.f32.mrf.mxu1 }
 0x1da   : > { %v963_v47 = vadd.f32 %v2480_v39, %v962_v45  ;;  %v988_v48 = vadd.f32 %v2481_v40, %v987_v46  ;;  %v1099_v24 = vpop.permute.xlu1 %1098  ;;  %v1109_v41 = vsel %vm1105_vm8, %v3194_v30, -1e+30 }
 0x1db   : > { %v3192_v28 = vmul.f32 %v1099_v24, %v1076_v15 }
 0x1dc   : > { %v1049_v51 = vpack.c.bf16 %v963_v47, %v963_v47  ;;  %v1050_v52 = vpack.c.bf16 %v988_v48, %v988_v48 }
 0x1dd   : > { %2118 = vmatmul.msk.bf16.vlgmr.msrb.gmra.mxu2 %vm1112_vm6, %v3161_v49  ;;  %2119 = vmatmul.msk.bf16.vlgmr.msrb.gmra.mxu3 %vm1112_vm6, %v3163_v50  ;;  %v1111_v33 = vsel %vm1105_vm8, %v3192_v28, -1e+30 }
 0x1de   : > { %1063 = vst.msk [vmem:[%s1062_s23] sm:$0xf] %vm1056_vm5, %v1049_v51  ;;  %v1234_v55 = vsel %vm1232_vm7, %v1049_v51, 0  ;;  %v1253_v56 = vsel %vm1232_vm7, %v1050_v52, 0 }
 0x1df   : > { %1064 = vst.msk [vmem:[%s1062_s23 + $0x4] sm:$0xf] %vm1056_vm5, %v1050_v52  ;;  %1243 = vmatpush.bf16.msra.mxu0 %v1234_v55  ;;  %1262 = vmatpush.bf16.msra.mxu1 %v1253_v56 }
 0x1e0   : > { %v1012_v57 = vpop.f32.mrf.mxu2  ;;  %v1037_v58 = vpop.f32.mrf.mxu3 }
 0x1e1   : > { %v1013_v59 = vadd.f32 %v2482_v53, %v1012_v57  ;;  %v1038_v60 = vadd.f32 %v2483_v54, %v1037_v58  ;;  %v964_v61 = vpop.f32.mrf.mxu0  ;;  %v989_v62 = vpop.f32.mrf.mxu1 }
 0x1e3   : > { %v1051_v63 = vpack.c.bf16 %v1013_v59, %v1013_v59  ;;  %v1052_v1 = vpack.c.bf16 %v1038_v60, %v1038_v60 }
 0x1e5   : > { %1065 = vst.msk [vmem:[%s1062_s23 + $0x8] sm:$0xf] %vm1056_vm5, %v1051_v63  ;;  %v1272_v3 = vsel %vm1232_vm7, %v1051_v63, 0  ;;  %v1291_v4 = vsel %vm1232_vm7, %v1052_v1, 0 }
 0x1e6   : > { %1066 = vst.msk [vmem:[%s1062_s23 + $0xc] sm:$0xf] %vm1056_vm5, %v1052_v1  ;;  %1281 = vmatpush.bf16.msra.mxu2 %v1272_v3  ;;  %1300 = vmatpush.bf16.msra.mxu3 %v1291_v4 }
 0x1e8   : > { %v1014_v7 = vpop.f32.mrf.mxu2  ;;  %v1039_v9 = vpop.f32.mrf.mxu3 }
 0x254   : > { %v1128_v20 = vpop.f32.mrf.mxu0  ;;  %v1147_v21 = vpop.f32.mrf.mxu1 }
 0x255   : > { %v1129_v22 = vadd.f32 %v1128_v20, %v1108_v19  ;;  %v1148_v42 = vadd.f32 %v1147_v21, %v1109_v41 }
 0x257   : > { %v1189_v23 = vsel %vm1112_vm6, %v1129_v22, -inf  ;;  %v1192_v45 = vsel %vm1112_vm6, %v1148_v42, -inf }
 0x258   : > { %1190 = vmax.xlane.f32.xlu2 %v1189_v23 }
 0x25c   : > { %v1130_v26 = vpop.f32.mrf.mxu0  ;;  %v1149_v27 = vpop.f32.mrf.mxu1 }
 0x260   : > { %v1166_v32 = vpop.f32.mrf.mxu2  ;;  %v1185_v34 = vpop.f32.mrf.mxu3 }
 0x261   : > { %v1167_v37 = vadd.f32 %v1166_v32, %v1110_v31  ;;  %v1186_v38 = vadd.f32 %v1185_v34, %v1111_v33 }
 0x263   : > { %v1198_v39 = vsel %vm1112_vm6, %v1186_v38, -inf  ;;  %v1195_v40 = vsel %vm1112_vm6, %v1167_v37, -inf }
 0x264   : > { %1199 = vmax.xlane.f32.xlu1 %v1198_v39  ;;  %1196 = vmax.xlane.f32.xlu0 %v1195_v40 }
 0x268   : > { %v1168_v43 = vpop.f32.mrf.mxu2  ;;  %v1187_v44 = vpop.f32.mrf.mxu3 }
 0x26c   : > { %1193 = vmax.xlane.f32.xlu0 %v1192_v45 }
 0x2cb   : > { %v3205_v46 = vpop.xlane.xlu2 %1190  }
 0x2cc   : > { %v1201_v47 = vsub.f32 %v1129_v22, %v3205_v46 }
 0x2ce   : > { %v1205_v48 = vmul.f32 1.442695, %v1201_v47 }
 0x2d0   : > { %2492 = vpow2.f32 %v1205_v48 }
 0x2d6   : > { %v2493_v51 = vpop.eup %2492 }
 0x2d7   : > { %v1225_v52 = vpack.c.bf16 %v2493_v51, %v2493_v51  ;;  %v1200_v53 = vpop.xlane.xlu1 %1199   ;;  %v1197_v54 = vpop.xlane.xlu0 %1196   ;;  %v1213_v55 = vsel %vm1112_vm6, %v2493_v51, 0.0 }
 0x2d8   : > { %v1204_v56 = vsub.f32 %v1186_v38, %v1200_v53  ;;  %v1203_v57 = vsub.f32 %v1167_v37, %v1197_v54  ;;  %1214 = vadd.xlane.f32.xlu0 %v1213_v55 }
 0x2d9   : > { %2120 = vmatmul.msk.bf16.vlgmr.msra.gmra.mxu0 %vm1112_vm6, %v1225_v52 }
 0x2da   : > { %v1211_v58 = vmul.f32 1.442695, %v1204_v56  ;;  %v1209_v59 = vmul.f32 1.442695, %v1203_v57 }
 0x2dc   : > { %2494 = vpow2.f32 %v1211_v58 }
 0x2dd   : > { %2496 = vpow2.f32 %v1209_v59 }
 0x2df   : > { %v1194_v60 = vpop.xlane.xlu0 %1193  }
 0x2e0   : > { %v1202_v61 = vsub.f32 %v1148_v42, %v1194_v60 }
 0x2e2   : > { %v2495_v62 = vpop.eup %2494  ;;  %v1207_v63 = vmul.f32 1.442695, %v1202_v61 }
 0x2e3   : > { %v2497_v1 = vpop.eup %2496  ;;  %v1228_v3 = vpack.c.bf16 %v2495_v62, %v2495_v62  ;;  %v1222_v13 = vsel %vm1112_vm6, %v2495_v62, 0.0 }
 0x2e4   : > { %v1227_v4 = vpack.c.bf16 %v2497_v1, %v2497_v1  ;;  %2498 = vpow2.f32 %v1207_v63  ;;  %v1219_v12 = vsel %vm1112_vm6, %v2497_v1, 0.0 }
 0x2e5   : > { %2123 = vmatmul.msk.bf16.vlgmr.msra.gmra.mxu3 %vm1112_vm6, %v1228_v3 }
 0x2e6   : > { %2122 = vmatmul.msk.bf16.vlgmr.msra.gmra.mxu2 %vm1112_vm6, %v1227_v4 }
 0x2ea   : > { %v2499_v7 = vpop.eup %2498 }
 0x2eb   : > { %v1226_v9 = vpack.c.bf16 %v2499_v7, %v2499_v7  ;;  %v1216_v10 = vsel %vm1112_vm6, %v2499_v7, 0.0 }
 0x2ec   : > { %1217 = vadd.xlane.f32.xlu0 %v1216_v10 }
 0x2ed   : > { %2121 = vmatmul.msk.bf16.vlgmr.msra.gmra.mxu1 %vm1112_vm6, %v1226_v9 }
 0x2f4   : > { %1220 = vadd.xlane.f32.xlu0 %v1219_v12 }
 0x2fc   : > { %1223 = vadd.xlane.f32.xlu0 %v1222_v13 }
 0x34b   : > { %v1215_v14 = vpop.xlane.xlu0 %1214  }
 0x34c   : > { %v3628_v39 = vmov %v1215_v14 }
 0x356   : > { %v1245_v15 = vpop.f32.mrf.mxu0  }
 0x357   : > { %v3624_v33 = vmov %v1245_v15 }
 0x35e   : > { %v1247_v16 = vpop.f32.mrf.mxu0 }
 0x35f   : > { %v1218_v18 = vpop.xlane.xlu0 %1217  }
 0x360   : > { %v3627_v38 = vmov %v1218_v18 }
 0x367   : > { %v1221_v19 = vpop.xlane.xlu0 %1220  }
 0x368   : > { %v1302_v20 = vpop.f32.mrf.mxu3   ;;  %v3626_v37 = vmov %v1221_v19 }
 0x369   : > { %v1283_v21 = vpop.f32.mrf.mxu2   ;;  %v3621_v29 = vmov %v1302_v20 }
 0x36a   : > { %v1264_v22 = vpop.f32.mrf.mxu1   ;;  %v3622_v31 = vmov %v1283_v21 }
 0x36b   : > { %v3623_v32 = vmov %v1264_v22 }
 0x36e   : > { %1938 = sbr.rel (%p2124_p0) target bundleno = 1310 (0x51e), region = 132 }
 0x36f   : > { %v1224_v23 = vpop.xlane.xlu0 %1223  }
 0x370   : > { %v1304_v24 = vpop.f32.mrf.mxu3  ;;  %v3625_v34 = vmov %v1224_v23 }
 0x371   : > { %v1285_v26 = vpop.f32.mrf.mxu2 }
 0x372   : > { %v1266_v27 = vpop.f32.mrf.mxu1 }
 0x373 LB: >> { %v2801_v40 = vmov 0   ;;  %s2213_s26 = sshll.u32 %s2765_s25, 4  ;;  %s1337_s22 = ssub.s32 %s2765_s25, %s2697_s30  ;;  %s2765_s25 = sphi %s3259_s25, %s1309_s25   ;;  %v2761_v46 = vphi %v3205_v46, %v3641_v46   ;;  %v2757_v60 = vphi %v1194_v60, %v3640_v60   ;;  %v2753_v54 = vphi %v1197_v54, %v3639_v54   ;;  %v2749_v53 = vphi %v1200_v53, %v3638_v53   ;;  %v2745_v14 = vphi %v1215_v14, %v3637_v14   ;;  %v2741_v18 = vphi %v1218_v18, %v3636_v18   ;;  %v2737_v19 = vphi %v1221_v19, %v3635_v19   ;;  %v2733_v23 = vphi %v1224_v23, %v3634_v23   ;;  %v2729_v15 = vphi %v1245_v15, %v3633_v15   ;;  %v2725_v22 = vphi %v1264_v22, %v3632_v22   ;;  %v2721_v21 = vphi %v1283_v21, %v3631_v21   ;;  %v2717_v20 = vphi %v1302_v20, %v3630_v20  }
 0x374   : >> { %2501 = vset.pattern.permute.xlu1 %v2801_v40  ;;  %2500 = vset.pattern.permute.xlu0 %v2801_v40  ;;  %s2128_s16 = sshll.u32 %s1337_s22, 3  ;;  %s1326_s3 = scalar_lea.vmem [#allocation2], %s2213_s26 }
 0x375   : >> { %v1327_v41 = vld [vmem:[%s1326_s3] sm:$0xf]  ;;  %v1328_v42 = vld [vmem:[%s1326_s3 + $0x4] sm:$0xf]  ;;  %v1329_v43 = vld [vmem:[%s1326_s3 + $0x8] sm:$0xf]  ;;  %s1339_s24 = scvt.s32.f32 %s2128_s16 }
 0x376   : >> { %v1374_v44 = vsel %vm1112_vm6, %v1327_v41, 0  ;;  %v1390_v45 = vsel %vm1112_vm6, %v1328_v42, 0  ;;  %v1406_v47 = vsel %vm1112_vm6, %v1329_v43, 0  ;;  %v1330_v48 = vld [vmem:[%s1326_s3 + $0xc] sm:$0xf]  ;;  %s1332_s21 = scalar_lea.vmem [#allocation3], %s2213_s26 }
 0x377   : >> { %1383 = vmatpush.bf16.xpose.msra.mxu0 %v1374_v44  ;;  %1399 = vmatpush.bf16.xpose.msra.mxu1 %v1390_v45  ;;  %v1422_v51 = vsel %vm1112_vm6, %v1330_v48, 0  ;;  %v1340_v52 = vstv %s1339_s24  ;;  %v1333_v44 = vld [vmem:[%s1332_s21] sm:$0xf]  ;;  %v1334_v45 = vld [vmem:[%s1332_s21 + $0x4] sm:$0xf]  ;;  %s1309_s25 = sadd.s32 1, %s2765_s25  }
 0x378   : >> { %1415 = vmatpush.bf16.xpose.msra.mxu2 %v1406_v47  ;;  %1431 = vmatpush.bf16.xpose.msra.mxu3 %v1422_v51  ;;  %v1341_v55 = vmul.f32 %v1340_v52, %v3106_v6  ;;  %v1343_v56 = vmul.f32 %v1340_v52, %v3095_v2  ;;  %v1342_v59 = vmul.f32 %v1340_v52, %v3114_v11  ;;  %v1509_v47 = vsel %vm1232_vm7, %v1333_v44, 0  ;;  %v1335_v51 = vld [vmem:[%s1332_s21 + $0x8] sm:$0xf]  ;;  %p3377_p1 = scmp.ge.s32.totalorder %s1309_s25, %s2697_s30 }
 0x379   : >> { %v1344_v61 = vmul.f32 %v1340_v52, %v3101_v5  ;;  %v1528_v48 = vsel %vm1232_vm7, %v1334_v45, 0  ;;  %v1336_v52 = vld [vmem:[%s1332_s21 + $0xc] sm:$0xf] }
 0x37a   : >> { %v1349_v57 = vperm.slane %v1341_v55, 0  ;;  %v1351_v58 = vperm.slane %v1343_v56, 0  ;;  %v1350_v62 = vperm.slane %v1342_v59, 0  ;;  %v1547_v55 = vsel %vm1232_vm7, %v1335_v51, 0 }
 0x37b   : >> { %v1352_v63 = vperm.slane %v1344_v61, 0  ;;  %v1566_v56 = vsel %vm1232_vm7, %v1336_v52, 0 }
 0x37c   : >> { %1354 = vperm.xlu1 %2501, %v1349_v57   ;;  %1362 = vperm.xlu0 %2500, %v1351_v58  }
 0x37e   : >> { %2129 = vmatmul.msk.bf16.vlgmr.msra.gmra.mxu0 %vm1112_vm6, %v3143_v35  ;;  %2130 = vmatmul.msk.bf16.vlgmr.msra.gmra.mxu1 %vm1112_vm6, %v3145_v36 }
 0x37f   : >> { %2131 = vmatmul.msk.bf16.vlgmr.msra.gmra.mxu2 %vm1112_vm6, %v3161_v49  ;;  %2132 = vmatmul.msk.bf16.vlgmr.msra.gmra.mxu3 %vm1112_vm6, %v3163_v50 }
 0x380   : >> { %1518 = vmatpush.bf16.msrb.mxu0 %v1509_v47  ;;  %1537 = vmatpush.bf16.msrb.mxu1 %v1528_v48 }
 0x381   : >> { %1556 = vmatpush.bf16.msrb.mxu2 %v1547_v55  ;;  %1575 = vmatpush.bf16.msrb.mxu3 %v1566_v56 }
 0x384   : >> { %1358 = vperm.xlu1 %2501, %v1350_v62   ;;  %1366 = vperm.xlu0 %2500, %v1352_v63  }
 0x3ee   : >> { %v1355_v1 = vpop.permute.xlu1 %1354  ;;  %v1363_v4 = vpop.permute.xlu0 %1362 }
 0x3ef   : >> { %v1369_v7 = vadd.f32 %v1355_v1, %v3185_v17  ;;  %v1371_v27 = vadd.f32 %v1363_v4, %v3190_v25 }
 0x3f6   : >> { %v1359_v3 = vpop.permute.xlu1 %1358  ;;  %v1367_v29 = vpop.permute.xlu0 %1366 }
 0x3f7   : >> { %v1370_v9 = vadd.f32 %v1359_v3, %v3194_v30  ;;  %v1372_v38 = vadd.f32 %v1367_v29, %v3192_v28 }
 0x3fb   : >> { %v1385_v10 = vpop.f32.mrf.mxu0  ;;  %v1401_v12 = vpop.f32.mrf.mxu1 }
 0x3fc   : >> { %v1386_v13 = vadd.f32 %v1385_v10, %v1369_v7  ;;  %v1402_v16 = vadd.f32 %v1401_v12, %v1370_v9 }
 0x3fe   : >> { %v1440_v24 = vsel %vm1112_vm6, %v1402_v16, -inf  ;;  %v1437_v26 = vsel %vm1112_vm6, %v1386_v13, -inf }
 0x3ff   : >> { %1441 = vmax.xlane.f32.xlu1 %v1440_v24  ;;  %1438 = vmax.xlane.f32.xlu0 %v1437_v26 }
 0x402   : >> { %v1417_v31 = vpop.f32.mrf.mxu2  ;;  %v1433_v32 = vpop.f32.mrf.mxu3 }
 0x403   : >> { %v1418_v33 = vadd.f32 %v1417_v31, %v1371_v27  ;;  %v1387_v34 = vpop.f32.mrf.mxu0  ;;  %v1403_v37 = vpop.f32.mrf.mxu1  ;;  %v1434_v40 = vadd.f32 %v1433_v32, %v1372_v38 }
 0x405   : >> { %v1443_v39 = vsel %vm1112_vm6, %v1418_v33, -inf  ;;  %v1446_v43 = vsel %vm1112_vm6, %v1434_v40, -inf }
 0x406   : >> { %1444 = vmax.xlane.f32.xlu2 %v1443_v39 }
 0x40a   : >> { %v1419_v41 = vpop.f32.mrf.mxu2  ;;  %v1435_v42 = vpop.f32.mrf.mxu3 }
 0x40e   : >> { %1447 = vmax.xlane.f32.xlu2 %v1446_v43 }
 0x472   : >> { %v1442_v57 = vpop.xlane.xlu1 %1441  ;;  %v1439_v58 = vpop.xlane.xlu0 %1438 }
 0x473   : >> { %v3336_v59 = vmax.f32 %v2757_v60, %v1442_v57   ;;  %v3339_v61 = vmax.f32 %v2761_v46, %v1439_v58  }
 0x475   : >> { %v1454_v62 = vsub.f32 %v2757_v60, %v3336_v59  ;;  %v1466_v63 = vsub.f32 %v1402_v16, %v3336_v59  ;;  %v1453_v1 = vsub.f32 %v2761_v46, %v3339_v61  ;;  %v1465_v3 = vsub.f32 %v1386_v13, %v3339_v61 }
 0x477   : >> { %v1471_v4 = vmul.f32 1.442695, %v1466_v63  ;;  %v1469_v7 = vmul.f32 1.442695, %v1465_v3  ;;  %v1457_v42 = vmul.f32 1.442695, %v1453_v1 }
 0x478   : >> { %v1459_v43 = vmul.f32 1.442695, %v1454_v62 }
 0x479   : >> { %v1445_v9 = vpop.xlane.xlu2 %1444  ;;  %2502 = vpow2.f32 %v1471_v4 }
 0x47a   : >> { %v3348_v10 = vmax.f32 %v2753_v54, %v1445_v9   ;;  %2504 = vpow2.f32 %v1469_v7 }
 0x47c   : >> { %v1455_v12 = vsub.f32 %v2753_v54, %v3348_v10  ;;  %v1467_v60 = vsub.f32 %v1418_v33, %v3348_v10 }
 0x47e   : >> { %v1473_v24 = vmul.f32 1.442695, %v1467_v60  ;;  %v1461_v51 = vmul.f32 1.442695, %v1455_v12 }
 0x47f   : >> { %v2503_v16 = vpop.eup %2502 }
 0x480   : >> { %2506 = vpow2.f32 %v1473_v24  ;;  %v1502_v46 = vpack.c.bf16 %v2503_v16, %v2503_v16  ;;  %v2505_v27 = vpop.eup %2504  ;;  %v1484_v38 = vsel %vm1112_vm6, %v2503_v16, 0.0 }
 0x481   : >> { %v1448_v26 = vpop.xlane.xlu2 %1447  ;;  %v1481_v29 = vsel %vm1112_vm6, %v2505_v27, 0.0  ;;  %v1501_v31 = vpack.c.bf16 %v2505_v27, %v2505_v27 }
 0x482   : >> { %v3354_v13 = vmax.f32 %v2749_v53, %v1448_v26   ;;  %2134 = vmatmul.msk.bf16.vlgmr.msrb.gmra.mxu1 %vm1112_vm6, %v1502_v46  ;;  %1482 = vadd.xlane.f32.xlu2 %v1481_v29 }
 0x483   : >> { %2133 = vmatmul.msk.bf16.vlgmr.msrb.gmra.mxu0 %vm1112_vm6, %v1501_v31 }
 0x484   : >> { %v1456_v32 = vsub.f32 %v2749_v53, %v3354_v13  ;;  %v1468_v54 = vsub.f32 %v1434_v40, %v3354_v13 }
 0x486   : >> { %v1475_v33 = vmul.f32 1.442695, %v1468_v54  ;;  %v2507_v34 = vpop.eup %2506  ;;  %v1463_v3 = vmul.f32 1.442695, %v1456_v32 }
 0x487   : >> { %v1503_v37 = vpack.c.bf16 %v2507_v34, %v2507_v34  ;;  %v1487_v53 = vsel %vm1112_vm6, %v2507_v34, 0.0 }
 0x488   : >> { %2508 = vpow2.f32 %v1475_v33 }
 0x489   : >> { %2135 = vmatmul.msk.bf16.vlgmr.msrb.gmra.mxu2 %vm1112_vm6, %v1503_v37  ;;  %2510 = vpow2.f32 %v1457_v42 }
 0x48a   : >> { %1485 = vadd.xlane.f32.xlu2 %v1484_v38  ;;  %2512 = vpow2.f32 %v1459_v43 }
 0x48b   : >> { %2514 = vpow2.f32 %v1461_v51 }
 0x48c   : >> { %2516 = vpow2.f32 %v1463_v3 }
 0x48e   : >> { %v2509_v39 = vpop.eup %2508 }
 0x48f   : >> { %v1504_v41 = vpack.c.bf16 %v2509_v39, %v2509_v39  ;;  %v1490_v40 = vsel %vm1112_vm6, %v2509_v39, 0.0  ;;  %v2511_v44 = vpop.eup %2510 }
 0x490   : >> { %v1477_v45 = vmul.f32 %v2745_v14, %v2511_v44  ;;  %v2513_v52 = vpop.eup %2512  ;;  %v1497_v1 = vmul.f32 %v2729_v15, %v2511_v44 }
 0x491   : >> { %2136 = vmatmul.msk.bf16.vlgmr.msrb.gmra.mxu3 %vm1112_vm6, %v1504_v41  ;;  %v1478_v55 = vmul.f32 %v2741_v18, %v2513_v52  ;;  %v1498_v57 = vmul.f32 %v2725_v22, %v2513_v52  ;;  %v2515_v7 = vpop.eup %2514 }
 0x492   : >> { %1488 = vadd.xlane.f32.xlu2 %v1487_v53  ;;  %v1479_v14 = vmul.f32 %v2737_v19, %v2515_v7  ;;  %v2517_v18 = vpop.eup %2516  ;;  %v1499_v26 = vmul.f32 %v2721_v21, %v2515_v7  ;;  %v3638_v53 = vmov %v3354_v13 }
 0x493   : >> { %v1480_v46 = vmul.f32 %v2733_v23, %v2517_v18  ;;  %v1500_v15 = vmul.f32 %v2717_v20, %v2517_v18 }
 0x49a   : >> { %1491 = vadd.xlane.f32.xlu2 %v1490_v40 }
 0x4f5   : >> { %v1483_v47 = vpop.xlane.xlu2 %1482 }
 0x4f6   : >> { %v1493_v48 = vadd.f32 %v1483_v47, %v1477_v45  }
 0x4f8   : > { %v3648_v39 = vmov (%p3377_p1), %v1493_v48 }
 0x4fd   : >> { %v1486_v56 = vpop.xlane.xlu2 %1485 }
 0x4fe   : >> { %v1494_v58 = vadd.f32 %v1486_v56, %v1478_v55  }
 0x4ff   : >> { %v1539_v63 = vpop.f32.mrf.mxu1 }
 0x500   : >> { %v1582_v62 = vadd.f32 %v1539_v63, %v1498_v57   ;;  %v1520_v4 = vpop.f32.mrf.mxu0  ;;  %v3636_v18 = vmov %v1494_v58  ;;  %v3647_v38 = vmov (%p3377_p1), %v1494_v58 }
 0x501   : >> { %v1581_v9 = vadd.f32 %v1520_v4, %v1497_v1  }
 0x505   : >> { %v1489_v12 = vpop.xlane.xlu2 %1488 }
 0x506   : >> { %v1495_v24 = vadd.f32 %v1489_v12, %v1479_v14   ;;  %v3637_v14 = vmov %v1493_v48 }
 0x507   : >> { %v1541_v60 = vpop.f32.mrf.mxu1 }
 0x508   : >> { %v1522_v16 = vpop.f32.mrf.mxu0  ;;  %v3635_v19 = vmov %v1495_v24  ;;  %v3640_v60 = vmov %v3336_v59  ;;  %v3646_v37 = vmov (%p3377_p1), %v1495_v24 }
 0x50c   : >> { %v1558_v22 = vpop.f32.mrf.mxu2 }
 0x50d   : >> { %v1583_v27 = vadd.f32 %v1558_v22, %v1499_v26   ;;  %v1492_v29 = vpop.xlane.xlu2 %1491  ;;  %v3632_v22 = vmov %v1582_v62 }
 0x50e   : >> { %v1496_v34 = vadd.f32 %v1492_v29, %v1480_v46   ;;  %v3641_v46 = vmov %v3339_v61 }
 0x50f   : >> { %v3631_v21 = vmov %v1583_v27 }
 0x510   : >> { %v3634_v23 = vmov %v1496_v34 }
 0x514   : >> { %v1560_v31 = vpop.f32.mrf.mxu2  ;;  %v1577_v32 = vpop.f32.mrf.mxu3 }
 0x515   : >> { %v1584_v33 = vadd.f32 %v1577_v32, %v1500_v15   ;;  %v3633_v15 = vmov %v1581_v9  ;;  %v3643_v31 = vmov (%p3377_p1), %v1583_v27  ;;  %v3644_v32 = vmov (%p3377_p1), %v1582_v62 }
 0x517   : >> { %v3630_v20 = vmov %v1584_v33  ;;  %v3642_v29 = vmov (%p3377_p1), %v1584_v33  ;;  %v3645_v33 = vmov (%p3377_p1), %v1581_v9 }
 0x519   : > { %1311 = sbr.rel (!%p3377_p1) target bundleno = 883 (0x373), region = 138 }
 0x51c   : >> { %v1579_v54 = vpop.f32.mrf.mxu3 }
 0x51d   : >> { %v3639_v54 = vmov %v3348_v10 }
 0x51e PF: > { %v1598_v2 = vld [vmem:[%s3576_s9 + $0x4] sm:$0xf]  ;;  %2523 = vrcp.f32 %v2793_v38  ;;  %v1599_v5 = vld [vmem:[%s3576_s9 + $0x8] sm:$0xf]  ;;  %v1597_v6 = vld [vmem:[%s3576_s9] sm:$0xf]  ;;  %v2797_v39 = vphi %v3628_v39, %v3648_v39   ;;  %v2793_v38 = vphi %v3627_v38, %v3647_v38   ;;  %v2789_v37 = vphi %v3626_v37, %v3646_v37   ;;  %v2785_v34 = vphi %v3625_v34, %v1496_v34   ;;  %v2781_v33 = vphi %v3624_v33, %v3645_v33   ;;  %v2777_v32 = vphi %v3623_v32, %v3644_v32   ;;  %v2773_v31 = vphi %v3622_v31, %v3643_v31   ;;  %v2769_v29 = vphi %v3621_v29, %v3642_v29  }
 0x51f   : > { %v1624_v11 = vsel %vm1232_vm7, %v1598_v2, 0  ;;  %v1643_v35 = vsel %vm1232_vm7, %v1599_v5, 0  ;;  %v1605_v36 = vsel %vm1232_vm7, %v1597_v6, 0  ;;  %2525 = vrcp.f32 %v2797_v39  ;;  %v1600_v49 = vld [vmem:[%s3576_s9 + $0xc] sm:$0xf]  ;;  %v2224_v14 = vld [vmem:[%s3582_s15 + $0x38] sm:$0xff] }
 0x520   : > { %1633 = vmatpush.bf16.msra.mxu2 %v1624_v11  ;;  %1614 = vmatpush.bf16.msra.mxu0 %v1605_v36  ;;  %v1662_v50 = vsel %vm1232_vm7, %v1600_v49, 0  ;;  %2527 = vrcp.f32 %v2785_v34  ;;  %v2518_v52 = vld [vmem:[%s3577_s10] ss:$0 sm:$0xff]  ;;  %v2216_v9 = vld [vmem:[%s3580_s13 + $0x8] sm:$0xff]  ;;  %v2223_v54 = vld [vmem:[%s3582_s15 + $0x30] sm:$0xff]  ;;  %s2183_s3 = sshll.u32 %s2701_s0, 1 }
 0x521   : > { %1671 = vmatpush.bf16.msra.mxu3 %v1662_v50  ;;  %2529 = vrcp.f32 %v2789_v37  ;;  %1837 = vmatpush.bf16.msra.mxu1 %v2224_v14  ;;  %v2222_v2 = vld [vmem:[%s3582_s15 + $0x28] sm:$0xff]  ;;  %v2221_v5 = vld [vmem:[%s3582_s15 + $0x20] sm:$0xff]  ;;  %v2220_v6 = vld [vmem:[%s3582_s15 + $0x18] sm:$0xff]  ;;  %s1863_s24 = sadd.s32 %s2697_s30, %s2183_s3  ;;  %s3649_s23 = sld [smem:[#allocation21_spill]] }
 0x522   : > { %v2219_v11 = vld [vmem:[%s3582_s15 + $0x10] sm:$0xff]  ;;  %v2217_v36 = vld [vmem:[%s3582_s15] sm:$0xff]  ;;  %s2184_s21 = sshll.u32 %s1863_s24, 3  ;;  %s3651_s16 = sld [smem:[#allocation22_spill]] }
 0x523   : > { %v2521_v49 = vld [vmem:[%s3581_s14] ss:$0 sm:$0xff]  ;;  %s3652_s4 = scalar_lea.vmem [#allocation4], %s2987_s18  ;;  %s3654_s0 = sand.u32 1, %s2689_s28  }
 0x524   : > { %1652 = vmatpush.bf16.msrb.mxu2 %v1643_v35  ;;  %v2524_v17 = vpop.eup %2523  ;;  %1752 = vmatpush.bf16.msrb.mxu0 %v2216_v9  ;;  %v2218_v35 = vld [vmem:[%s3582_s15 + $0x8] sm:$0xff]  ;;  %s1867_s5 = sshll.u32 %s3652_s4, 4  ;;  %s3653_s30 = smov %s3652_s4  ;;  %s1868_s5 = int_to_ptr.vmem [resolvable:$true] %s1867_s5 }
 0x525   : > { %v2526_v25 = vpop.eup %2525  ;;  %v1590_v28 = vmul.f32 %v2777_v32, %v2524_v17  ;;  %1838 = vmatpush.bf16.msra.mxu1 %v2223_v54  ;;  %s1853_s3 = scalar_lea.sflag [#allocation5], %s3654_s0 }
 0x526   : > { %v2528_v30 = vpop.eup %2527  ;;  %v1589_v19 = vmul.f32 %v2781_v33, %v2526_v25 }
 0x527   : > { %v1594_v20 = vpack.c.bf16 %v1590_v28, %v1590_v28  ;;  %v1592_v21 = vmul.f32 %v2769_v29, %v2528_v30  ;;  %v2530_v61 = vpop.eup %2529  ;;  %v2519_v29 = vld [vmem:[%s3578_s11] ss:$0 sm:$0xff] }
 0x528   : > { %v1593_v23 = vpack.c.bf16 %v1589_v19, %v1589_v19  ;;  %v1591_v10 = vmul.f32 %v2773_v31, %v2530_v61  ;;  %s1865_s19 = scalar_lea.hbm %s3651_s16, %s2184_s21 }
 0x529   : > { %2138 = vmatmul.msk.bf16.vlgmr.msra.gmra.mxu2 %vm1112_vm6, %v1594_v20  ;;  %v1596_v59 = vpack.c.bf16 %v1592_v21, %v1592_v21  ;;  %1839 = vmatpush.bf16.msra.mxu1 %v2222_v2  ;;  %s1869_s6 = sshll.u32 %s1865_s19, 4  ;;  %s2555_s19 = scalar_lea.hbm %s3651_s16, 32  ;;  %s1870_s6 = int_to_ptr.hbm [resolvable:$true] %s1869_s6 }
 0x52a   : > { %2137 = vmatmul.msk.bf16.vlgmr.msra.gmra.mxu0 %vm1112_vm6, %v1593_v23  ;;  %v1595_v13 = vpack.c.bf16 %v1591_v10, %v1591_v10  ;;  %s2549_s24 = sshra.s32 %s1870_s6, 4  ;;  %s2550_s24 = int_to_ptr.hbm [resolvable:$true] %s2549_s24 }
 0x52b   : > { %2140 = vmatmul.msk.bf16.vlgmr.msra.gmra.mxu3 %vm1112_vm6, %v1596_v59  ;;  %s2551_s27 = scalar_lea.hbm %s2550_s24, 8  ;;  %p2556_p6 = scmp.lt.s32.totalorder %s2550_s24, %s3651_s16 }
 0x52c   : > { %p2552_p2 = scmp.ne.s32.totalorder %s2550_s24, %s2551_s27  ;;  %p2557_p7 = scmp.lt.s32.totalorder %s2555_s19, %s2551_s27 }
 0x52d   : > { %1840 = vmatpush.bf16.msra.mxu1 %v2221_v5 }
 0x52e   : > { %p2553_p4 = pnand %p2552_p2, %p2948_p3  ;;  %p2558_p9 = por %p2557_p7, %p2556_p6 }
 0x530   : > { %p2554_p5 = pneg %p2553_p4 }
 0x531   : > { %1841 = vmatpush.bf16.msra.mxu1 %v2220_v6 }
 0x532   : > { %p2559_p10 = pnand %p2558_p9, %p2554_p5 }
 0x535   : > { %1842 = vmatpush.bf16.msra.mxu1 %v2219_v11 }
 0x539   : > { %2139 = vmatmul.msk.bf16.vlgmr.msrb.gmra.mxu2 %vm1112_vm6, %v1595_v13  ;;  %1843 = vmatpush.bf16.msra.mxu1 %v2218_v35 }
 0x53d   : > { %1844 = vmatpush.bf16.msra.mxu1 %v2217_v36 }
 0x5a7   : > { %v1616_v38 = vpop.f32.mrf.mxu0 }
 0x5a8   : > { %v1677_v37 = vsel %vm603_vm0, %v1616_v38, 0.0  ;;  %v2522_v38 = vld [vmem:[%s3649_s23] ss:$0 sm:$0xff] }
 0x5ac   : > { %v1635_v39 = vpop.f32.mrf.mxu2 }
 0x5ad   : > { %v1678_v43 = vsel %vm603_vm0, %v1635_v39, 0.0 }
 0x5ae   : > { %v1673_v41 = vpop.f32.mrf.mxu3  ;;  %v1679_v44 = vadd.f32 %v1678_v43, %v1677_v37 }
 0x5af   : > { %v1618_v53 = vpop.f32.mrf.mxu0  ;;  %v1682_v47 = vsel %vm603_vm0, %v1673_v41, 0.0 }
 0x5b4   : > { %v1637_v40 = vpop.f32.mrf.mxu2 }
 0x5b6   : > { %v1675_v42 = vpop.f32.mrf.mxu3 }
 0x5bc   : > { %v1654_v45 = vpop.f32.mrf.mxu2 }
 0x5bd   : > { %v1680_v48 = vsel %vm603_vm0, %v1654_v45, 0.0 }
 0x5be   : > { %v1681_v51 = vadd.f32 %v1680_v48, %v1679_v44 }
 0x5c0   : > { %v1683_v55 = vadd.f32 %v1682_v47, %v1681_v51 }
 0x5c2   : > { %v1688_v56 = vadd.f32 %v2518_v52, %v1683_v55 }
 0x5c4   : > { %v1656_v57 = vpop.f32.mrf.mxu2  ;;  %v3465_v58 = vadd.f32 %v1688_v56, %v2975_v0  ;;  %v2215_v0 = vld [vmem:[%s3580_s13] sm:$0xff] }
 0x5c5   : > { %1753 = vmatpush.bf16.msrb.mxu0 %v2215_v0 }
 0x5c6   : > { %v1692_v63 = vsel %vm603_vm0, %v3465_v58, 0.0 }
 0x5c7   : > { %1693 = vadd.xlane.f32.xlu0 %v1692_v63 }
 0x63a   : > { %v1694_v3 = vpop.xlane.xlu0 %1693 }
 0x63b   : > { %v1695_v1 = vmul.f32 %v1694_v3, %v2979_v8 }
 0x63d   : > { %v1696_v62 = vsub.f32 %v3465_v58, %v1695_v1 }
 0x63f   : > { %v1697_v4 = vmul.f32 %v1696_v62, %v1696_v62 }
 0x641   : > { %v1698_v7 = vsel %vm603_vm0, %v1697_v4, 0.0 }
 0x642   : > { %1699 = vadd.xlane.f32.xlu0 %v1698_v7 }
 0x6b5   : > { %v1700_v12 = vpop.xlane.xlu0 %1699 }
 0x6b6   : > { %v1701_v24 = vmul.f32 %v1700_v12, %v2979_v8  ;;  %v2520_v8 = vld [vmem:[%s3579_s12] ss:$0 sm:$0xff] }
 0x6b8   : > { %v1702_v60 = vadd.f32 1e-05, %v1701_v24 }
 0x6ba   : > { %2531 = vrsqrt.f32 %v1702_v60  ;;  %vm1709_vm10 = vweird.f32 %v1702_v60 }
 0x6c0   : > { %v2532_v16 = vpop.eup %2531 }
 0x6c1   : > { %v1704_v18 = vmul.f32 %v2532_v16, %v1702_v60  ;;  %vm1710_vm9 = vweird.f32 %v2532_v16 }
 0x6c2   : > { %vm1711_vm11 = vmor %vm1709_vm10, %vm1710_vm9 }
 0x6c3   : > { %v1705_v26 = vmul.f32 %v2532_v16, %v1704_v18 }
 0x6c5   : > { %v1706_v22 = vmul.f32 0.5, %v1705_v26 }
 0x6c7   : > { %v1707_v27 = vsub.f32 1.5, %v1706_v22 }
 0x6c9   : > { %v1708_v46 = vmul.f32 %v2532_v16, %v1707_v27 }
 0x6cb   : > { %v1712_v34 = vsel %vm1711_vm11, %v2532_v16, %v1708_v46 }
 0x6cc   : > { %v1713_v15 = vmul.f32 %v1712_v34, %v1696_v62 }
 0x6ce   : > { %v1717_v31 = vmul.f32 %v2519_v29, %v1713_v15 }
 0x6d0   : > { %v1721_v32 = vadd.f32 %v2520_v8, %v1717_v31 }
 0x6d2   : > { %v1722_v33 = vpack.c.bf16 %v1721_v32, %v1721_v32 }
 0x6d4   : > { %2149 = vmatmul.msk.bf16.vlgmr.msrb.gmra.mxu0 %vm603_vm0, %v1722_v33 }
 0x751   : > { %v1755_v50 = vpop.f32.mrf.mxu0 }
 0x752   : > { %v1756_v17 = vadd.f32 %v2521_v49, %v1755_v50 }
 0x754   : > { %v1759_v25 = vmul.f32 %v1756_v17, %v1756_v17 }
 0x756   : > { %v1760_v28 = vmul.f32 %v1759_v25, %v1756_v17 }
 0x758   : > { %v1761_v30 = vmul.f32 0.044715, %v1760_v28 }
 0x759   : > { %v1757_v19 = vpop.f32.mrf.mxu0 }
 0x75a   : > { %v1762_v20 = vadd.f32 %v1761_v30, %v1756_v17 }
 0x75c   : > { %v1763_v21 = vmul.f32 0.7978846, %v1762_v20 }
 0x75e   : > { %2533 = vtanh.f32 %v1763_v21 }
 0x764   : > { %v2534_v23 = vpop.eup %2533 }
 0x765   : > { %v1765_v59 = vadd.f32 1.0, %v2534_v23 }
 0x767   : > { %v1766_v61 = vmul.f32 0.5, %v1765_v59 }
 0x769   : > { %v1767_v10 = vmul.f32 %v1766_v61, %v1756_v17 }
 0x76b   : > { %v1768_v13 = vpack.c.bf16 %v1767_v10, %v1767_v10 }
 0x76d   : > { %1845 = vmatmul.bf16.vlgmr.msra.gmra.mxu1 %v1768_v13 }
 0x7ea   : > { %v1846_v39 = vpop.f32.mrf.mxu1 }
 0x7eb   : > { %v1847_v41 = vadd.f32 %v2522_v38, %v1846_v39 }
 0x7ed   : > { %v1850_v53 = vadd.f32 %v1847_v41, %v3465_v58 }
 0x7ef   : > { %1851 = vst.msk [vmem:[%s3653_s30] sm:$0xff] %vm603_vm0, %v1850_v53 }
 0x7f0   : > { %2562 = shalt.err (!%p2559_p10)
}
 0x7f1   : > { %2225 = dma.vmem_to_hbm [thread:$0]  (%p2948_p3), %s1868_s5, 128, %s1870_s6, %s1853_s3  }
 0x7f2   : > { %v1848_v40 = vpop.f32.mrf.mxu1 }
 0x7f3 PF: > { %s3655_s18 = sld [smem:[#allocation7_spill]]  ;;  %p2231_p11 = scmp.ge.s32.totalorder %s2713_s20, 2 }
 0x7f5   : > { %p2228_p12 = pnand %p2231_p11, %p2957_p8 }
 0x7f7   : > { %p2229_p13 = pneg %p2228_p12 }
 0x7f9   : > { %s1881_s22 = sand.u32 1, %s3655_s18  }
 0x7fa   : > { %s1882_s30 = scalar_lea.sflag [#allocation5], %s1881_s22 }
 0x7fb   : > { %2680 = dma.done.wait (%p2229_p13), %s1882_s30, 128  }
 0x7fc   : > { %2682 = vsyncadd (%p2229_p13), %s1882_s30, 4294967168  ;;  %s31_s20 = sadd.s32 1, %s2713_s20   ;;  %s3657_s30 = sld [smem:[#allocation8_spill]] }
 0x7fd   : > { %p28_p0 = scmp.ge.s32.totalorder %s31_s20, 6   ;;  %s3658_s0 = sld [smem:[#allocation9_spill]] }
 0x7fe   : > { %s3659_s19 = sld [smem:[#allocation10_spill]]  ;;  %s3661_s27 = smov %s2689_s28 }
 0x7ff   : > { %s3660_s1 = sld [smem:[#allocation12_spill]]  ;;  %s3662_s28 = smov %s2693_s29 }
 0x800   : > { %s3663_s29 = smov %s2966_s2  ;;  %30 = sbr.rel (!%p28_p0) target bundleno = 15 (0xf), region = 149 }
 0x805   :  { %1888 = vsyncpa [#allocation5], 1 }
 0x806   :  { %1890 = vsyncpa [#allocation5 + $0x1], 1 }

</bundles_post_ra>
